<compile_context>
chip_gen: v5e
topology: v5e:2x2
jax: 0.10.0
libtpu: 0.0.40
codegen_flags: <defaults>
</compile_context>

<pallas_src>
import functools

import jax
import jax.numpy as jnp
from jax import lax
from jax.experimental import pallas as pl
from jax.experimental.pallas import tpu as pltpu


_VMEM_LIMIT_BYTES = 32 * 1024 * 1024   # raise v5e's 16 MiB scoped default; fits v7x's 64 MiB physical
_TILE_BUDGET_BYTES = 16 * 1024 * 1024  # per-tile buffer budget, well under the scoped limit


def _round_up(a, b):
    return (a + b - 1) // b * b


def _pick_tm(m, t_pad, t_out, c_in, c_out_p, k):
    """Largest multiple-of-8 M-tile whose per-tile VMEM footprint fits the budget.

    Counts Pallas' double-buffered input/output blocks plus the fp32 in-kernel
    intermediates (im2col tile + MXU accumulator).
    """
    bytes_per_row = 4 * (2 * t_pad * c_in        # input tile (double-buffered)
                         + 2 * t_out * c_out_p   # pre-BN output tile (double-buffered)
                         + t_out * k * c_in      # im2col intermediate
                         + t_out * c_out_p)      # fp32 accumulator
    tm = max(8, (_TILE_BUDGET_BYTES // bytes_per_row) // 8 * 8)
    return int(min(tm, _round_up(m, 8)))


def _conv_stats_kernel(xp_ref, w_ref, y_ref, stats_ref, *,
                       kernel_size, stride, dilation, t_out, mxu_dtype):
    # xp_ref:    (TM, T_pad, C_in)      padded input tile
    # w_ref:     (K*C_in, C_out_p)      folded conv weights (lane-padded C_out)
    # y_ref:     (TM, T_out, C_out_p)   pre-BN conv output tile
    # stats_ref: (2, C_out_p)           grid-resident [sum; sum_of_squares]
    i = pl.program_id(0)

    @pl.when(i == 0)
    def _init():
        stats_ref[...] = jnp.zeros_like(stats_ref)

    tm = y_ref.shape[0]
    c_out_p = y_ref.shape[2]

    # On-tile im2col: slice the Ref per tap (short live ranges, no full-tile
    # materialization) and concatenate the taps on the lane axis so the whole
    # temporal kernel becomes a single deep contraction.
    cols = []
    if stride == 1:
        for k in range(kernel_size):
            start = k * dilation
            cols.append(xp_ref[:, start:start + t_out, :])
    else:
        # TODO(synk): stride>1 falls back to a strided value slice (materializes
        # a VMEM copy); pre-stride in the wrapper / index_map if this path gets hot.
        xp = xp_ref[...]
        for k in range(kernel_size):
            start = k * dilation
            stop = start + (t_out - 1) * stride + 1
            cols.append(xp[:, start:stop:stride, :])
    x_col = jnp.concatenate(cols, axis=-1).astype(mxu_dtype)     # (TM, T_out, K*C_in)
    x2d = x_col.reshape(tm * t_out, x_col.shape[-1])

    # One MXU matmul per tile, fp32 accumulation.
    acc = jnp.dot(x2d, w_ref[...], preferred_element_type=jnp.float32)  # (TM*T_out, C_out_p)

    y_ref[...] = acc.reshape(tm, t_out, c_out_p).astype(y_ref.dtype)

    # Streaming BN statistics (biased): per-channel sum and sum-of-squares,
    # accumulated across M-tiles in the resident stats block.
    s1 = jnp.sum(acc, axis=0, keepdims=True)          # (1, C_out_p)
    s2 = jnp.sum(acc * acc, axis=0, keepdims=True)    # (1, C_out_p)
    stats_ref[...] += jnp.concatenate([s1, s2], axis=0)


def _bn_apply_kernel(y_ref, scale_ref, shift_ref, out_ref):
    # y_ref: (TM, T_out, C_out_p); scale/shift: (1, 1, C_out_p)
    y = y_ref[...].astype(jnp.float32)
    out_ref[...] = (y * scale_ref[...] + shift_ref[...]).astype(out_ref.dtype)


def temporal_conv_bn(x, weight, bias, gamma, beta, *,
                     kernel_size, stride=1, dilation=1, eps=1e-5,
                     mxu_dtype=jnp.bfloat16):
    """x: (N, C_in, T, V) NCHW; weight: (C_out, C_in, K, 1); returns (N, C_out, T_out, V).

    Matches Conv2d(kernel=(K,1), padding=(pad,0), stride=(stride,1),
    dilation=(dilation,1)) followed by BatchNorm2d in training mode (batch
    statistics).  `bias` is accepted for API parity but unused: it cancels
    exactly under training-mode batch norm.
    """
    del bias  # cancels under training-mode BN
    n_b, c_in, t, v = x.shape
    c_out = weight.shape[0]
    k = kernel_size
    pad = (k + (k - 1) * (dilation - 1) - 1) // 2
    t_pad = t + 2 * pad
    t_out = (t + 2 * pad - dilation * (k - 1) - 1) // stride + 1

    # Lane-dense output channels (multiple of 128); the extra channels carry
    # zero weights / gamma / beta and are sliced off at the end.
    c_out_p = _round_up(max(c_out, 128), 128)

    m = n_b * v
    tm = _pick_tm(m, t_pad, t_out, c_in, c_out_p, k)
    m_pad = _round_up(m, tm)
    num_tiles = m_pad // tm

    # Layout glue: NCHW -> (M, T_pad, C_in), zero time-halo and zero M-padding.
    # Zero-padded rows produce exactly-zero conv output (no bias), so they do
    # not perturb the streamed statistics.
    # TODO(synk): keeping activations in (N, V, T, C) between layers would remove
    # this transpose (and the inverse one below), saving a full HBM pass each way.
    xp = jnp.transpose(x, (0, 3, 2, 1)).reshape(m, t, c_in)
    xp = jnp.pad(xp, ((0, m_pad - m), (pad, pad), (0, 0)))

    # Conv weights folded for the im2col contraction: row index = k*C_in + c_in.
    w2 = jnp.transpose(weight[..., 0], (2, 1, 0)).reshape(k * c_in, c_out)
    w2 = jnp.pad(w2, ((0, 0), (0, c_out_p - c_out))).astype(mxu_dtype)

    kern_a = functools.partial(_conv_stats_kernel, kernel_size=k, stride=stride,
                               dilation=dilation, t_out=t_out, mxu_dtype=mxu_dtype)
    y_pre, stats = pl.pallas_call(
        kern_a,
        grid=(num_tiles,),
        in_specs=[
            pl.BlockSpec((tm, t_pad, c_in), lambda i: (i, 0, 0)),
            pl.BlockSpec((k * c_in, c_out_p), lambda i: (0, 0)),
        ],
        out_specs=(
            pl.BlockSpec((tm, t_out, c_out_p), lambda i: (i, 0, 0)),
            pl.BlockSpec((2, c_out_p), lambda i: (0, 0)),
        ),
        out_shape=(
            jax.ShapeDtypeStruct((m_pad, t_out, c_out_p), mxu_dtype),
            jax.ShapeDtypeStruct((2, c_out_p), jnp.float32),
        ),
        compiler_params=pltpu.CompilerParams(
            dimension_semantics=("arbitrary",),     # stats accumulate across M tiles
            vmem_limit_bytes=_VMEM_LIMIT_BYTES),
    )(xp, w2)

    # Per-channel BN finalization (tiny, plain JAX): var = E[y^2] - mean^2,
    # folded into a single scale/shift FMA for the apply pass.
    cnt = jnp.float32(m * t_out)                    # real (un-padded) element count
    mean = stats[0] / cnt
    var = jnp.maximum(stats[1] / cnt - mean * mean, 0.0)
    inv = lax.rsqrt(var + eps)
    gamma_p = jnp.pad(gamma.astype(jnp.float32), (0, c_out_p - c_out))
    beta_p = jnp.pad(beta.astype(jnp.float32), (0, c_out_p - c_out))
    scale = (gamma_p * inv).reshape(1, 1, c_out_p)
    shift = (beta_p - mean * gamma_p * inv).reshape(1, 1, c_out_p)

    y = pl.pallas_call(
        _bn_apply_kernel,
        grid=(num_tiles,),
        in_specs=[
            pl.BlockSpec((tm, t_out, c_out_p), lambda i: (i, 0, 0)),
            pl.BlockSpec((1, 1, c_out_p), lambda i: (0, 0, 0)),
            pl.BlockSpec((1, 1, c_out_p), lambda i: (0, 0, 0)),
        ],
        out_specs=pl.BlockSpec((tm, t_out, c_out_p), lambda i: (i, 0, 0)),
        out_shape=jax.ShapeDtypeStruct((m_pad, t_out, c_out_p), x.dtype),
        compiler_params=pltpu.CompilerParams(
            dimension_semantics=("parallel",),      # independent tiles -> both v7x cores
            vmem_limit_bytes=_VMEM_LIMIT_BYTES),
    )(y_pre, scale, shift)

    # Back to NCHW, dropping M and channel padding.
    y = y[:m, :, :c_out].reshape(n_b, v, t_out, c_out).transpose(0, 3, 2, 1)
    return y


def _reference(x, weight, bias, gamma, beta, *, stride, dilation, pad, eps=1e-5):
    y = lax.conv_general_dilated(
        x, weight, window_strides=(stride, 1),
        padding=((pad, pad), (0, 0)), rhs_dilation=(dilation, 1),
        dimension_numbers=('NCHW', 'OIHW', 'NCHW'))
    y = y + bias[None, :, None, None]
    mean = jnp.mean(y, axis=(0, 2, 3), keepdims=True)
    var = jnp.mean((y - mean) ** 2, axis=(0, 2, 3), keepdims=True)
    return (gamma[None, :, None, None] * (y - mean) * lax.rsqrt(var + eps)
            + beta[None, :, None, None])


if __name__ == "__main__":
    # Small shapes consistent with the module: NCHW = (batch, in_ch, time, vertices)
    N, C_IN, C_OUT, T, V, K = 2, 4, 8, 16, 16, 3
    STRIDE, DILATION = 1, 1
    PAD = (K + (K - 1) * (DILATION - 1) - 1) // 2

    key = jax.random.PRNGKey(0)
    kx, kw, kb = jax.random.split(key, 3)
    x = jax.random.normal(kx, (N, C_IN, T, V), dtype=jnp.float32)

    # Deterministic parameter init (Conv2d-style uniform fan-in scaling).
    fan_in = C_IN * K * 1
    bound = 1.0 / (fan_in ** 0.5)
    weight = jax.random.uniform(kw, (C_OUT, C_IN, K, 1), jnp.float32, -bound, bound)
    bias = jax.random.uniform(kb, (C_OUT,), jnp.float32, -bound, bound)
    gamma = jnp.ones((C_OUT,), jnp.float32)   # BatchNorm2d default init
    beta = jnp.zeros((C_OUT,), jnp.float32)

    y_ref = _reference(x, weight, bias, gamma, beta,
                       stride=STRIDE, dilation=DILATION, pad=PAD)

    # 1) fp32 MXU path: tight numerical check against the fp32 reference.
    y32 = temporal_conv_bn(x, weight, bias, gamma, beta,
                           kernel_size=K, stride=STRIDE, dilation=DILATION,
                           mxu_dtype=jnp.float32)
    y32 = jax.block_until_ready(y32)
    assert y32.shape == (N, C_OUT, T, V), y32.shape
    assert jnp.allclose(y32, y_ref, atol=1e-4, rtol=1e-4), \
        float(jnp.max(jnp.abs(y32 - y_ref)))

    # 2) bf16 MXU path (production default on v6e/v7x; fp32 accumulation + fp32
    #    BN math).  Loose ballpark check only — rigor is covered by the fp32 run.
    ybf = temporal_conv_bn(x, weight, bias, gamma, beta,
                           kernel_size=K, stride=STRIDE, dilation=DILATION,
                           mxu_dtype=jnp.bfloat16)
    ybf = jax.block_until_ready(ybf)
    assert ybf.shape == (N, C_OUT, T, V), ybf.shape
    assert jnp.allclose(ybf, y_ref, atol=1e-1, rtol=1e-1), \
        float(jnp.max(jnp.abs(ybf - y_ref)))

    print("KERNEL_OK")
</pallas_src>

<mosaic_0001>
module attributes {stable_mosaic.version = 11 : i64} {
  func.func @_conv_stats_kernel(%arg0: i32, %arg1: memref<32x18x4xf32, #tpu.memory_space<vmem>>, %arg2: memref<12x128xf32, #tpu.memory_space<vmem>>, %arg3: memref<32x16x128xf32, #tpu.memory_space<vmem>>, %arg4: memref<2x128xf32, #tpu.memory_space<vmem>>) attributes {dimension_semantics = [#tpu.dimension_semantics<arbitrary>], iteration_bounds = array<i64: 1>, scalar_prefetch = 0 : i64, scratch_operands = 0 : i64, tpu.core_type = #tpu.core_type<tc>, window_params = [{transform_indices = @transform_0, window_bounds = array<i64: 32, 18, 4>}, {pipeline_mode = #tpu.pipeline_mode<synchronous>, transform_indices = @transform_1, window_bounds = array<i64: 12, 128>}, {transform_indices = @transform_2, window_bounds = array<i64: 32, 16, 128>}, {pipeline_mode = #tpu.pipeline_mode<synchronous>, transform_indices = @transform_3, window_bounds = array<i64: 2, 128>}]} {
    %c0_i32 = arith.constant 0 : i32
    %0 = arith.cmpi eq, %arg0, %c0_i32 : i32
    %1 = arith.extui %0 : i1 to i32
    %c0_i32_0 = arith.constant 0 : i32
    %2 = arith.cmpi ne, %1, %c0_i32_0 : i32
    scf.if %2 {
      %cst_18 = arith.constant 0.000000e+00 : f32
      %21 = vector.broadcast %cst_18 : f32 to vector<2x128xf32>
      %c0_19 = arith.constant 0 : index
      %c0_20 = arith.constant 0 : index
      %22 = vector.load %arg4[%c0_19, %c0_20] : memref<2x128xf32, #tpu.memory_space<vmem>>, vector<2x128xf32>
      tpu.vector_store %arg4[%c0_19, %c0_20], %21 {strides = array<i32>} : memref<2x128xf32, #tpu.memory_space<vmem>>, vector<2x128xf32>,
    } else {
    }
    %c0 = arith.constant 0 : index
    %c0_1 = arith.constant 0 : index
    %c0_2 = arith.constant 0 : index
    %3 = vector.load %arg1[%c0, %c0_1, %c0_2] : memref<32x18x4xf32, #tpu.memory_space<vmem>>, vector<32x16x4xf32>
    %c0_3 = arith.constant 0 : index
    %c1 = arith.constant 1 : index
    %c0_4 = arith.constant 0 : index
    %4 = vector.load %arg1[%c0_3, %c1, %c0_4] : memref<32x18x4xf32, #tpu.memory_space<vmem>>, vector<32x16x4xf32>
    %c0_5 = arith.constant 0 : index
    %c2 = arith.constant 2 : index
    %c0_6 = arith.constant 0 : index
    %5 = vector.load %arg1[%c0_5, %c2, %c0_6] : memref<32x18x4xf32, #tpu.memory_space<vmem>>, vector<32x16x4xf32>
    %6 = tpu.concatenate %3, %4, %5 in 2 : vector<32x16x4xf32>, vector<32x16x4xf32>, vector<32x16x4xf32> -> vector<32x16x12xf32>
    %7 = vector.shape_cast %6 : vector<32x16x12xf32> to vector<512x12xf32>
    %c0_7 = arith.constant 0 : index
    %c0_8 = arith.constant 0 : index
    %8 = vector.load %arg2[%c0_7, %c0_8] : memref<12x128xf32, #tpu.memory_space<vmem>>, vector<12x128xf32>
    %cst = arith.constant dense<0.000000e+00> : vector<512x128xf32>
    %9 = tpu.matmul %7, %8, %cst {dimension_numbers = #tpu.dot_dimension_numbers<[1], [0], [0], [1], [0, 0, 1, 1], [], []>} : vector<512x12xf32>, vector<12x128xf32>, vector<512x128xf32> -> vector<512x128xf32>
    %10 = vector.shape_cast %9 : vector<512x128xf32> to vector<32x16x128xf32>
    %c0_9 = arith.constant 0 : index
    %c0_10 = arith.constant 0 : index
    %c0_11 = arith.constant 0 : index
    %11 = vector.load %arg3[%c0_9, %c0_10, %c0_11] : memref<32x16x128xf32, #tpu.memory_space<vmem>>, vector<32x16x128xf32>
    tpu.vector_store %arg3[%c0_9, %c0_10, %c0_11], %10 {strides = array<i32>} : memref<32x16x128xf32, #tpu.memory_space<vmem>>, vector<32x16x128xf32>,
    %cst_12 = arith.constant dense<0.000000e+00> : vector<128xf32>
    %12 = vector.multi_reduction <add>, %9, %cst_12 [0] : vector<512x128xf32> to vector<128xf32>
    %13 = vector.shape_cast %12 : vector<128xf32> to vector<1x128xf32>
    %14 = arith.mulf %9, %9 : vector<512x128xf32>
    %cst_13 = arith.constant dense<0.000000e+00> : vector<128xf32>
    %15 = vector.multi_reduction <add>, %14, %cst_13 [0] : vector<512x128xf32> to vector<128xf32>
    %16 = vector.shape_cast %15 : vector<128xf32> to vector<1x128xf32>
    %c0_14 = arith.constant 0 : index
    %c0_15 = arith.constant 0 : index
    %17 = vector.load %arg4[%c0_14, %c0_15] : memref<2x128xf32, #tpu.memory_space<vmem>>, vector<2x128xf32>
    %18 = tpu.concatenate %13, %16 in 0 : vector<1x128xf32>, vector<1x128xf32> -> vector<2x128xf32>
    %19 = arith.addf %17, %18 : vector<2x128xf32>
    %c0_16 = arith.constant 0 : index
    %c0_17 = arith.constant 0 : index
    %20 = vector.load %arg4[%c0_16, %c0_17] : memref<2x128xf32, #tpu.memory_space<vmem>>, vector<2x128xf32>
    tpu.vector_store %arg4[%c0_16, %c0_17], %19 {strides = array<i32>} : memref<2x128xf32, #tpu.memory_space<vmem>>, vector<2x128xf32>,
    return
  }
  func.func @transform_0(%arg0: i32) -> (i32, i32, i32) {
    %c0_i32 = arith.constant 0 : i32
    %c0_i32_0 = arith.constant 0 : i32
    %c0_i32_1 = arith.constant 0 : i32
    return %arg0, %c0_i32, %c0_i32_0 : i32, i32, i32
  }
  func.func @transform_1(%arg0: i32) -> (i32, i32) {
    %c0_i32 = arith.constant 0 : i32
    %c0_i32_0 = arith.constant 0 : i32
    %c0_i32_1 = arith.constant 0 : i32
    return %c0_i32, %c0_i32_0 : i32, i32
  }
  func.func @transform_2(%arg0: i32) -> (i32, i32, i32) {
    %c0_i32 = arith.constant 0 : i32
    %c0_i32_0 = arith.constant 0 : i32
    %c0_i32_1 = arith.constant 0 : i32
    return %arg0, %c0_i32, %c0_i32_0 : i32, i32, i32
  }
  func.func @transform_3(%arg0: i32) -> (i32, i32) {
    %c0_i32 = arith.constant 0 : i32
    %c0_i32_0 = arith.constant 0 : i32
    %c0_i32_1 = arith.constant 0 : i32
    return %c0_i32, %c0_i32_0 : i32, i32
  }
}

</mosaic_0001>

<bundles_post_ra>
// kernel: tpu_custom_call.1
= control target key start
LH: loop header
LB: loop body
LE: loop exit
PB: predicated region body
PF: predicated region fallthrough
CT: control target
= control target key end

     0   :  { %9 = vsyncpa [#allocation3], 0  ;;  %s1696_s16 = smov 4   ;;  %s2838_s0 = inlined_call_operand.vmem [shape: f32[32,18,4], index: 0, kind: input, shape index: {}]   ;;  %s2839_s1 = inlined_call_operand.vmem [shape: f32[12,128], index: 1, kind: input, shape index: {}]   ;;  %s2840_s2 = inlined_call_operand.hbm [shape: f32[32,16,128], index: 2, kind: output, shape index: {0}]   ;;  %s2841_s3 = inlined_call_operand.hbm [shape: f32[2,128], index: 3, kind: output, shape index: {1}]  }
   0x1   :  { %v85_v0 = vld [vmem:[%s2838_s0 + $0x9] sm:$0xff]  ;;  %v84_v1 = vld [vmem:[%s2838_s0 + $0x1] sm:$0xff]  ;;  %v86_v2 = vld [vmem:[%s2838_s0 + $0x19] sm:$0xff] }
   0x2   :  { %278 = vrot.lane.b32.xlu1 %v85_v0, %s1696_s16  ;;  %276 = vrot.lane.b32.xlu0 %v84_v1, %s1696_s16 }
   0x3   :  { %280 = vrot.lane.b32.xlu2 %v86_v2, %s1696_s16 }
   0x4   :  { %10 = vsyncpa [#allocation5], 0  ;;  %v149_v3 = vld [vmem:[%s2838_s0 + $0xa] sm:$0xff]  ;;  %v148_v4 = vld [vmem:[%s2838_s0 + $0x2] sm:$0xff]  ;;  %s1697_s25 = smov 8   ;;  %vm1049_vm0 = vcmask 1043456  }
   0x5   :  { %v150_v5 = vld [vmem:[%s2838_s0 + $0x1a] sm:$0xff]  ;;  %v151_v6 = vld [vmem:[%s2838_s0 + $0x22] sm:$0xff]  ;;  %v88_v8 = vld [vmem:[%s2838_s0 + $0x31] sm:$0xff]  ;;  %vm724_vm1 = vcmask 31744   ;;  %vm856_vm2 = vcmask 97280   ;;  %vm789_vm3 = vcmask 64512  }
   0x6   :  { %v87_v7 = vld [vmem:[%s2838_s0 + $0x21] sm:$0xff]  ;;  %v152_v9 = vld [vmem:[%s2838_s0 + $0x32] sm:$0xff]  ;;  %v101_v12 = vld [vmem:[%s2838_s0 + $0xc9] sm:$0xff]  ;;  %s1539_s12 = sshll.u32 %s2840_s2, 4  ;;  %s1699_s13 = smov [#allocation2]   ;;  %vm1529_vm4 = vcmask 1040384   ;;  %s1540_s12 = int_to_ptr.hbm [resolvable:$true] %s1539_s12 }
   0x7   :  { %v100_v10 = vld [vmem:[%s2838_s0 + $0xc1] sm:$0xff]  ;;  %v89_v13 = vld [vmem:[%s2838_s0 + $0x39] sm:$0xff]  ;;  %v90_v15 = vld [vmem:[%s2838_s0 + $0x49] sm:$0xff]  ;;  %s1537_s14 = sshll.u32 %s1699_s13, 4  ;;  %s1700_s15 = smov 128   ;;  %s1538_s14 = int_to_ptr.vmem [resolvable:$true] %s1537_s14 }
   0x8   :  { %v164_v11 = vld [vmem:[%s2838_s0 + $0xc2] sm:$0xff]  ;;  %v153_v14 = vld [vmem:[%s2838_s0 + $0x3a] sm:$0xff]  ;;  %v165_v16 = vld [vmem:[%s2838_s0 + $0xca] sm:$0xff]  ;;  %s1701_s2 = smov [#allocation4]  }
   0x9   :  { %v102_v17 = vld [vmem:[%s2838_s0 + $0xd9] sm:$0xff]  ;;  %v154_v19 = vld [vmem:[%s2838_s0 + $0x4a] sm:$0xff]  ;;  %v103_v22 = vld [vmem:[%s2838_s0 + $0xe1] sm:$0xff]  ;;  %s1551_s17 = sshll.u32 %s1701_s2, 4  ;;  %s1552_s17 = int_to_ptr.vmem [resolvable:$true] %s1551_s17 }
   0xa   :  { %534 = vrot.lane.b32.xlu1 %v149_v3, %s1697_s25  ;;  %532 = vrot.lane.b32.xlu0 %v148_v4, %s1697_s25  ;;  %v166_v18 = vld [vmem:[%s2838_s0 + $0xda] sm:$0xff]  ;;  %v91_v20 = vld [vmem:[%s2838_s0 + $0x51] sm:$0xff] }
   0xb   :  { %536 = vrot.lane.b32.xlu2 %v150_v5, %s1697_s25  ;;  %v155_v21 = vld [vmem:[%s2838_s0 + $0x52] sm:$0xff]  ;;  %v167_v23 = vld [vmem:[%s2838_s0 + $0xe2] sm:$0xff]  ;;  %v181_v30 = vld [vmem:[%s2838_s0 + $0x18a] sm:$0xff] }
   0xc   :  { %v180_v24 = vld [vmem:[%s2838_s0 + $0x182] sm:$0xff]  ;;  %v104_v28 = vld [vmem:[%s2838_s0 + $0xf1] sm:$0xff]  ;;  %v105_v34 = vld [vmem:[%s2838_s0 + $0xf9] sm:$0xff] }
   0xd   :  { %v116_v25 = vld [vmem:[%s2838_s0 + $0x181] sm:$0xff]  ;;  %v168_v29 = vld [vmem:[%s2838_s0 + $0xf2] sm:$0xff]  ;;  %v117_v31 = vld [vmem:[%s2838_s0 + $0x189] sm:$0xff] }
   0xe   :  { %v92_v26 = vld [vmem:[%s2838_s0 + $0x61] sm:$0xff]  ;;  %v93_v32 = vld [vmem:[%s2838_s0 + $0x69] sm:$0xff]  ;;  %v118_v40 = vld [vmem:[%s2838_s0 + $0x199] sm:$0xff] }
   0xf   :  { %v156_v27 = vld [vmem:[%s2838_s0 + $0x62] sm:$0xff]  ;;  %v157_v33 = vld [vmem:[%s2838_s0 + $0x6a] sm:$0xff]  ;;  %v169_v35 = vld [vmem:[%s2838_s0 + $0xfa] sm:$0xff] }
  0x10   :  { %v855_v36 = vld [vmem:[%s2839_s1 + $0x8] sm:$0xf]  ;;  %v854_v37 = vld [vmem:[%s2839_s1] sm:$0xff]  ;;  %v107_v54 = vld [vmem:[%s2838_s0 + $0x111] sm:$0xff] }
  0x11   :  { %1567 = vmatpush.msk.msra.mxu0 %vm1049_vm0, %v855_v36  ;;  %1632 = vmatpush.msk.msra.mxu1 %vm1049_vm0, %v855_v36  ;;  %v182_v39 = vld [vmem:[%s2838_s0 + $0x19a] sm:$0xff]  ;;  %v106_v44 = vld [vmem:[%s2838_s0 + $0x109] sm:$0xff]  ;;  %v171_v56 = vld [vmem:[%s2838_s0 + $0x112] sm:$0xff] }
  0x12   :  { %538 = vrot.lane.b32.xlu1 %v151_v6, %s1697_s25  ;;  %282 = vrot.lane.b32.xlu0 %v87_v7, %s1696_s16  ;;  %v94_v41 = vld [vmem:[%s2838_s0 + $0x79] sm:$0xff]  ;;  %v170_v45 = vld [vmem:[%s2838_s0 + $0x10a] sm:$0xff] }
  0x13   :  { %284 = vrot.lane.b32.xlu2 %v88_v8, %s1696_s16  ;;  %1633 = vmatpush.msk.msra.mxu2 %vm1049_vm0, %v855_v36  ;;  %v158_v43 = vld [vmem:[%s2838_s0 + $0x7a] sm:$0xff]  ;;  %v183_v47 = vld [vmem:[%s2838_s0 + $0x1a2] sm:$0xff]  ;;  %v120_v63 = vld [vmem:[%s2838_s0 + $0x1b1] sm:$0xff] }
  0x14   :  { %1068 = vmatpush.msra.mxu0 %v854_v37  ;;  %1635 = vmatpush.msra.mxu1 %v854_v37  ;;  %v119_v48 = vld [vmem:[%s2838_s0 + $0x1a1] sm:$0xff]  ;;  %v184_v1 = vld [vmem:[%s2838_s0 + $0x1b2] sm:$0xff] }
  0x15   :  { %1636 = vmatpush.msra.mxu2 %v854_v37  ;;  %1634 = vmatpush.msk.msra.mxu3 %vm1049_vm0, %v855_v36  ;;  %v95_v49 = vld [vmem:[%s2838_s0 + $0x81] sm:$0xff]  ;;  %v22_v7 = vld [vmem:[%s2838_s0 + $0x18] sm:$0xff] }
  0x16   :  { %v159_v53 = vld [vmem:[%s2838_s0 + $0x82] sm:$0xff]  ;;  %v96_v8 = vld [vmem:[%s2838_s0 + $0x91] sm:$0xff] }
  0x17   :  { %1637 = vmatpush.msra.mxu3 %v854_v37  ;;  %v20_v55 = vld [vmem:[%s2838_s0] sm:$0xff]  ;;  %v21_v0 = vld [vmem:[%s2838_s0 + $0x8] sm:$0xff] }
  0x18   :  { %v132_v62 = vld [vmem:[%s2838_s0 + $0x241] sm:$0xff] }
  0x1a   :  { %540 = vrot.lane.b32.xlu1 %v152_v9, %s1697_s25  ;;  %308 = vrot.lane.b32.xlu0 %v100_v10, %s1696_s16  ;;  %v196_v9 = vld [vmem:[%s2838_s0 + $0x242] sm:$0xff] }
  0x1b   :  { %564 = vrot.lane.b32.xlu2 %v164_v11, %s1697_s25  ;;  %v108_v10 = vld [vmem:[%s2838_s0 + $0x121] sm:$0xff] }
  0x22   :  { %310 = vrot.lane.b32.xlu1 %v101_v12, %s1696_s16  ;;  %286 = vrot.lane.b32.xlu0 %v89_v13, %s1696_s16  ;;  %v36_v12 = vld [vmem:[%s2838_s0 + $0xc0] sm:$0xff] }
  0x23   :  { %542 = vrot.lane.b32.xlu2 %v153_v14, %s1697_s25 }
  0x2a   :  { %288 = vrot.lane.b32.xlu1 %v90_v15, %s1696_s16  ;;  %566 = vrot.lane.b32.xlu0 %v165_v16, %s1697_s25 }
  0x2b   :  { %312 = vrot.lane.b32.xlu2 %v102_v17, %s1696_s16 }
  0x32   :  { %568 = vrot.lane.b32.xlu1 %v166_v18, %s1697_s25  ;;  %544 = vrot.lane.b32.xlu0 %v154_v19, %s1697_s25  ;;  %v23_v19 = vld [vmem:[%s2838_s0 + $0x20] sm:$0xff] }
  0x33   :  { %290 = vrot.lane.b32.xlu2 %v91_v20, %s1696_s16  ;;  %v172_v20 = vld [vmem:[%s2838_s0 + $0x122] sm:$0xff] }
  0x3a   :  { %546 = vrot.lane.b32.xlu1 %v155_v21, %s1697_s25  ;;  %314 = vrot.lane.b32.xlu0 %v103_v22, %s1696_s16  ;;  %v160_v21 = vld [vmem:[%s2838_s0 + $0x92] sm:$0xff] }
  0x3b   :  { %570 = vrot.lane.b32.xlu2 %v167_v23, %s1697_s25  ;;  %v121_v22 = vld [vmem:[%s2838_s0 + $0x1b9] sm:$0xff] }
  0x42   :  { %596 = vrot.lane.b32.xlu1 %v180_v24, %s1697_s25  ;;  %340 = vrot.lane.b32.xlu0 %v116_v25, %s1696_s16 }
  0x43   :  { %292 = vrot.lane.b32.xlu2 %v92_v26, %s1696_s16 }
  0x4a   :  { %548 = vrot.lane.b32.xlu1 %v156_v27, %s1697_s25  ;;  %316 = vrot.lane.b32.xlu0 %v104_v28, %s1696_s16  ;;  %v185_v28 = vld [vmem:[%s2838_s0 + $0x1ba] sm:$0xff] }
  0x4b   :  { %572 = vrot.lane.b32.xlu2 %v168_v29, %s1697_s25  ;;  %v133_v29 = vld [vmem:[%s2838_s0 + $0x249] sm:$0xff] }
  0x52   :  { %598 = vrot.lane.b32.xlu1 %v181_v30, %s1697_s25  ;;  %342 = vrot.lane.b32.xlu0 %v117_v31, %s1696_s16  ;;  %v24_v30 = vld [vmem:[%s2838_s0 + $0x30] sm:$0xff]  ;;  %v37_v31 = vld [vmem:[%s2838_s0 + $0xc8] sm:$0xff] }
  0x53   :  { %294 = vrot.lane.b32.xlu2 %v93_v32, %s1696_s16  ;;  %v197_v32 = vld [vmem:[%s2838_s0 + $0x24a] sm:$0xff] }
  0x5a   :  { %550 = vrot.lane.b32.xlu1 %v157_v33, %s1697_s25  ;;  %318 = vrot.lane.b32.xlu0 %v105_v34, %s1696_s16 }
  0x5b   :  { %574 = vrot.lane.b32.xlu2 %v169_v35, %s1697_s25 }
  0x5d   :  { %v281_v38 = vpop.permute.xlu2 %280 }
  0x5e   :  { %v727_v11 = vsel %vm724_vm1, %v22_v7, %v281_v38 }
  0x62   :  { %600 = vrot.lane.b32.xlu1 %v182_v39, %s1697_s25  ;;  %344 = vrot.lane.b32.xlu0 %v118_v40, %s1696_s16  ;;  %v25_v40 = vld [vmem:[%s2838_s0 + $0x38] sm:$0xff] }
  0x63   :  { %296 = vrot.lane.b32.xlu2 %v94_v41, %s1696_s16  ;;  %v109_v41 = vld [vmem:[%s2838_s0 + $0x129] sm:$0xff] }
  0x65   :  { %v537_v42 = vpop.permute.xlu2 %536 }
  0x66   :  { %v792_v16 = vsel %vm789_vm3, %v727_v11, %v537_v42  ;;  %v97_v42 = vld [vmem:[%s2838_s0 + $0x99] sm:$0xff] }
  0x6a   :  { %552 = vrot.lane.b32.xlu1 %v158_v43, %s1697_s25  ;;  %320 = vrot.lane.b32.xlu0 %v106_v44, %s1696_s16  ;;  %v38_v43 = vld [vmem:[%s2838_s0 + $0xd8] sm:$0xff] }
  0x6b   :  { %576 = vrot.lane.b32.xlu2 %v170_v45, %s1697_s25  ;;  %v161_v44 = vld [vmem:[%s2838_s0 + $0x9a] sm:$0xff] }
  0x6d   :  { %v1896_v46 = vpop.permute.xlu2 %284 }
  0x6e   :  { %v729_v33 = vsel %vm724_vm1, %v24_v30, %v1896_v46 }
  0x72   :  { %602 = vrot.lane.b32.xlu1 %v183_v47, %s1697_s25  ;;  %346 = vrot.lane.b32.xlu0 %v119_v48, %s1696_s16 }
  0x73   :  { %298 = vrot.lane.b32.xlu2 %v95_v49, %s1696_s16 }
  0x74   :  { %v279_v50 = vpop.permute.xlu1 %278  ;;  %v277_v51 = vpop.permute.xlu0 %276 }
  0x75   :  { %v565_v52 = vpop.permute.xlu2 %564  ;;  %v725_v57 = vsel %vm724_vm1, %v20_v55, %v277_v51  ;;  %v726_v2 = vsel %vm724_vm1, %v21_v0, %v279_v50  ;;  %v134_v55 = vld [vmem:[%s2838_s0 + $0x259] sm:$0xff] }
  0x76   :  { %v198_v0 = vld [vmem:[%s2838_s0 + $0x25a] sm:$0xff] }
  0x7a   :  { %554 = vrot.lane.b32.xlu1 %v159_v53, %s1697_s25  ;;  %322 = vrot.lane.b32.xlu0 %v107_v54, %s1696_s16  ;;  %v173_v53 = vld [vmem:[%s2838_s0 + $0x12a] sm:$0xff] }
  0x7b   :  { %578 = vrot.lane.b32.xlu2 %v171_v56, %s1697_s25  ;;  %v26_v54 = vld [vmem:[%s2838_s0 + $0x48] sm:$0xff]  ;;  %v39_v56 = vld [vmem:[%s2838_s0 + $0xe0] sm:$0xff] }
  0x7c   :  { %v535_v58 = vpop.permute.xlu1 %534  ;;  %v533_v59 = vpop.permute.xlu0 %532 }
  0x7d   :  { %v790_v60 = vsel %vm789_vm3, %v725_v57, %v533_v59  ;;  %v1928_v61 = vpop.permute.xlu2 %542  ;;  %v791_v5 = vsel %vm789_vm3, %v726_v2, %v535_v58  ;;  %v27_v2 = vld [vmem:[%s2838_s0 + $0x50] sm:$0xff] }
  0x7e   :  { %1568 = vmatmul.msk.f32.vlgmr.msra.gmra.mxu0 %vm856_vm2, %v790_v60 }
  0x82   :  { %372 = vrot.lane.b32.xlu1 %v132_v62, %s1696_s16  ;;  %348 = vrot.lane.b32.xlu0 %v120_v63, %s1696_s16 }
  0x83   :  { %604 = vrot.lane.b32.xlu2 %v184_v1, %s1697_s25  ;;  %v186_v1 = vld [vmem:[%s2838_s0 + $0x1ca] sm:$0xff] }
  0x84   :  { %v539_v3 = vpop.permute.xlu1 %538  ;;  %v283_v4 = vpop.permute.xlu0 %282 }
  0x85   :  { %v313_v6 = vpop.permute.xlu2 %312  ;;  %v728_v23 = vsel %vm724_vm1, %v23_v19, %v283_v4  ;;  %v52_v4 = vld [vmem:[%s2838_s0 + $0x180] sm:$0xff] }
  0x86   :  { %1569 = vmatmul.msk.f32.gmra.mxu0 %vm856_vm2, %v791_v5  ;;  %v793_v26 = vsel %vm789_vm3, %v728_v23, %v539_v3  ;;  %v743_v46 = vsel %vm724_vm1, %v38_v43, %v313_v6  ;;  %v98_v3 = vld [vmem:[%s2838_s0 + $0xa9] sm:$0xff] }
  0x8a   :  { %300 = vrot.lane.b32.xlu1 %v96_v8, %s1696_s16  ;;  %628 = vrot.lane.b32.xlu0 %v196_v9, %s1697_s25 }
  0x8b   :  { %324 = vrot.lane.b32.xlu2 %v108_v10, %s1696_s16 }
  0x8c   :  { %v541_v13 = vpop.permute.xlu1 %540  ;;  %v309_v14 = vpop.permute.xlu0 %308 }
  0x8d   :  { %v741_v15 = vsel %vm724_vm1, %v36_v12, %v309_v14  ;;  %v1971_v18 = vpop.permute.xlu2 %290  ;;  %v794_v37 = vsel %vm789_vm3, %v729_v33, %v541_v13  ;;  %v162_v12 = vld [vmem:[%s2838_s0 + $0xaa] sm:$0xff]  ;;  %v110_v13 = vld [vmem:[%s2838_s0 + $0x139] sm:$0xff] }
  0x8e   :  { %1570 = vmatmul.msk.f32.gmra.mxu0 %vm856_vm2, %v792_v16  ;;  %v806_v17 = vsel %vm789_vm3, %v741_v15, %v565_v52  ;;  %v122_v52 = vld [vmem:[%s2838_s0 + $0x1c9] sm:$0xff]  ;;  %v732_v5 = vsel %vm724_vm1, %v27_v2, %v1971_v18  ;;  %v28_v14 = vld [vmem:[%s2838_s0 + $0x60] sm:$0xff]  ;;  %v99_v33 = vld [vmem:[%s2838_s0 + $0xb1] sm:$0xff] }
  0x8f   :  { %1584 = vmatmul.msk.f32.vlgmr.msra.gmra.mxu1 %vm856_vm2, %v806_v17  ;;  %v174_v15 = vld [vmem:[%s2838_s0 + $0x13a] sm:$0xff]  ;;  %v40_v16 = vld [vmem:[%s2838_s0 + $0xf0] sm:$0xff] }
  0x90   :  { %v176_v2 = vld [vmem:[%s2838_s0 + $0x152] sm:$0xff] }
  0x92   :  { %580 = vrot.lane.b32.xlu1 %v172_v20, %s1697_s25  ;;  %556 = vrot.lane.b32.xlu0 %v160_v21, %s1697_s25 }
  0x93   :  { %350 = vrot.lane.b32.xlu2 %v121_v22, %s1696_s16 }
  0x94   :  { %v311_v24 = vpop.permute.xlu1 %310  ;;  %v287_v25 = vpop.permute.xlu0 %286 }
  0x95   :  { %v571_v27 = vpop.permute.xlu2 %570  ;;  %v742_v34 = vsel %vm724_vm1, %v37_v31, %v311_v24  ;;  %v730_v45 = vsel %vm724_vm1, %v25_v40, %v287_v25  ;;  %v135_v24 = vld [vmem:[%s2838_s0 + $0x261] sm:$0xff]  ;;  %v123_v25 = vld [vmem:[%s2838_s0 + $0x1d1] sm:$0xff] }
  0x96   :  { %1571 = vmatmul.msk.f32.gmra.mxu0 %vm856_vm2, %v793_v26  ;;  %v795_v49 = vsel %vm789_vm3, %v730_v45, %v1928_v61  ;;  %v187_v26 = vld [vmem:[%s2838_s0 + $0x1d2] sm:$0xff]  ;;  %v175_v45 = vld [vmem:[%s2838_s0 + $0x142] sm:$0xff] }
  0x9a   :  { %606 = vrot.lane.b32.xlu1 %v185_v28, %s1697_s25  ;;  %374 = vrot.lane.b32.xlu0 %v133_v29, %s1696_s16 }
  0x9b   :  { %630 = vrot.lane.b32.xlu2 %v197_v32, %s1697_s25 }
  0x9c   :  { %v289_v35 = vpop.permute.xlu1 %288  ;;  %v567_v36 = vpop.permute.xlu0 %566 }
  0x9d   :  { %v807_v38 = vsel %vm789_vm3, %v742_v34, %v567_v36  ;;  %v293_v39 = vpop.permute.xlu2 %292  ;;  %v731_v57 = vsel %vm724_vm1, %v26_v54, %v289_v35  ;;  %v199_v34 = vld [vmem:[%s2838_s0 + $0x262] sm:$0xff] }
  0x9e   :  { %1572 = vmatmul.msk.f32.gmra.mxu0 %vm856_vm2, %v794_v37  ;;  %1585 = vmatmul.msk.f32.gmra.mxu1 %vm856_vm2, %v807_v38  ;;  %v733_v17 = vsel %vm724_vm1, %v28_v14, %v293_v39  ;;  %v29_v35 = vld [vmem:[%s2838_s0 + $0x68] sm:$0xff]  ;;  %v41_v37 = vld [vmem:[%s2838_s0 + $0xf8] sm:$0xff] }
  0x9f   :  { %v111_v36 = vld [vmem:[%s2838_s0 + $0x141] sm:$0xff] }
  0xa0   :  { %v188_v54 = vld [vmem:[%s2838_s0 + $0x1e2] sm:$0xff]  ;;  %v201_v14 = vld [vmem:[%s2838_s0 + $0x27a] sm:$0xff] }
  0xa2   :  { %326 = vrot.lane.b32.xlu1 %v109_v41, %s1696_s16  ;;  %302 = vrot.lane.b32.xlu0 %v97_v42, %s1696_s16 }
  0xa3   :  { %558 = vrot.lane.b32.xlu2 %v161_v44, %s1697_s25 }
  0xa4   :  { %v569_v47 = vpop.permute.xlu1 %568  ;;  %v545_v48 = vpop.permute.xlu0 %544 }
  0xa5   :  { %v808_v50 = vsel %vm789_vm3, %v743_v46, %v569_v47  ;;  %v573_v51 = vpop.permute.xlu2 %572  ;;  %v796_v61 = vsel %vm789_vm3, %v731_v57, %v545_v48  ;;  %v163_v46 = vld [vmem:[%s2838_s0 + $0xb2] sm:$0xff]  ;;  %v124_v47 = vld [vmem:[%s2838_s0 + $0x1e1] sm:$0xff] }
  0xa6   :  { %1573 = vmatmul.msk.f32.gmra.mxu0 %vm856_vm2, %v795_v49  ;;  %1586 = vmatmul.msk.f32.gmra.mxu1 %vm856_vm2, %v808_v50  ;;  %v54_v48 = vld [vmem:[%s2838_s0 + $0x198] sm:$0xff] }
  0xa7   :  { %v200_v57 = vld [vmem:[%s2838_s0 + $0x272] sm:$0xff] }
  0xaa   :  { %352 = vrot.lane.b32.xlu1 %v122_v52, %s1696_s16  ;;  %582 = vrot.lane.b32.xlu0 %v173_v53, %s1697_s25 }
  0xab   :  { %376 = vrot.lane.b32.xlu2 %v134_v55, %s1696_s16  ;;  %v136_v55 = vld [vmem:[%s2838_s0 + $0x271] sm:$0xff] }
  0xac   :  { %v547_v58 = vpop.permute.xlu1 %546  ;;  %v315_v59 = vpop.permute.xlu0 %314 }
  0xad   :  { %v744_v60 = vsel %vm724_vm1, %v39_v56, %v315_v59  ;;  %v295_v63 = vpop.permute.xlu2 %294  ;;  %v797_v9 = vsel %vm789_vm3, %v732_v5, %v547_v58  ;;  %v30_v56 = vld [vmem:[%s2838_s0 + $0x78] sm:$0xff]  ;;  %v42_v58 = vld [vmem:[%s2838_s0 + $0x108] sm:$0xff]  ;;  %v55_v5 = vld [vmem:[%s2838_s0 + $0x1a0] sm:$0xff] }
  0xae   :  { %1574 = vmatmul.msk.f32.gmra.mxu0 %vm856_vm2, %v796_v61  ;;  %v809_v62 = vsel %vm789_vm3, %v744_v60, %v571_v27  ;;  %v53_v27 = vld [vmem:[%s2838_s0 + $0x188] sm:$0xff]  ;;  %v734_v38 = vsel %vm724_vm1, %v29_v35, %v295_v63 }
  0xaf   :  { %1587 = vmatmul.msk.f32.gmra.mxu1 %vm856_vm2, %v809_v62  ;;  %v202_v35 = vld [vmem:[%s2838_s0 + $0x28a] sm:$0xff] }
  0xb2   :  { %632 = vrot.lane.b32.xlu1 %v198_v0, %s1697_s25  ;;  %608 = vrot.lane.b32.xlu0 %v186_v1, %s1697_s25 }
  0xb3   :  { %304 = vrot.lane.b32.xlu2 %v98_v3, %s1696_s16  ;;  %v112_v3 = vld [vmem:[%s2838_s0 + $0x151] sm:$0xff] }
  0xb4   :  { %v597_v6 = vpop.permute.xlu1 %596  ;;  %v341_v7 = vpop.permute.xlu0 %340 }
  0xb5   :  { %v757_v8 = vsel %vm724_vm1, %v52_v4, %v341_v7  ;;  %v575_v11 = vpop.permute.xlu2 %574  ;;  %v125_v4 = vld [vmem:[%s2838_s0 + $0x1e9] sm:$0xff] }
  0xb6   :  { %1575 = vmatmul.msk.f32.gmra.mxu0 %vm856_vm2, %v797_v9  ;;  %v822_v10 = vsel %vm789_vm3, %v757_v8, %v597_v6 }
  0xb7   :  { %1600 = vmatmul.msk.f32.vlgmr.msra.gmra.mxu2 %vm856_vm2, %v822_v10 }
  0xba   :  { %560 = vrot.lane.b32.xlu1 %v162_v12, %s1697_s25  ;;  %328 = vrot.lane.b32.xlu0 %v110_v13, %s1696_s16  ;;  %v137_v12 = vld [vmem:[%s2838_s0 + $0x279] sm:$0xff] }
  0xbb   :  { %584 = vrot.lane.b32.xlu2 %v174_v15, %s1697_s25  ;;  %v31_v13 = vld [vmem:[%s2838_s0 + $0x80] sm:$0xff]  ;;  %v43_v15 = vld [vmem:[%s2838_s0 + $0x110] sm:$0xff] }
  0xbc   :  { %v549_v18 = vpop.permute.xlu1 %548  ;;  %v317_v19 = vpop.permute.xlu0 %316 }
  0xbd   :  { %v745_v20 = vsel %vm724_vm1, %v40_v16, %v317_v19  ;;  %v798_v21 = vsel %vm789_vm3, %v733_v17, %v549_v18  ;;  %v297_v23 = vpop.permute.xlu2 %296 }
  0xbe   :  { %1576 = vmatmul.msk.f32.gmra.mxu0 %vm856_vm2, %v798_v21  ;;  %v810_v22 = vsel %vm789_vm3, %v745_v20, %v573_v51  ;;  %v735_v59 = vsel %vm724_vm1, %v30_v56, %v297_v23  ;;  %v177_v23 = vld [vmem:[%s2838_s0 + $0x15a] sm:$0xff] }
  0xbf   :  { %1588 = vmatmul.msk.f32.gmra.mxu1 %vm856_vm2, %v810_v22 }
  0xc2   :  { %378 = vrot.lane.b32.xlu1 %v135_v24, %s1696_s16  ;;  %354 = vrot.lane.b32.xlu0 %v123_v25, %s1696_s16  ;;  %v113_v24 = vld [vmem:[%s2838_s0 + $0x159] sm:$0xff] }
  0xc3   :  { %610 = vrot.lane.b32.xlu2 %v187_v26, %s1697_s25  ;;  %v126_v25 = vld [vmem:[%s2838_s0 + $0x1f9] sm:$0xff]  ;;  %v56_v26 = vld [vmem:[%s2838_s0 + $0x1b0] sm:$0xff] }
  0xc4   :  { %v599_v28 = vpop.permute.xlu1 %598  ;;  %v343_v29 = vpop.permute.xlu0 %342 }
  0xc5   :  { %v758_v30 = vsel %vm724_vm1, %v53_v27, %v343_v29  ;;  %v577_v32 = vpop.permute.xlu2 %576 }
  0xc6   :  { %v823_v31 = vsel %vm789_vm3, %v758_v30, %v599_v28 }
  0xc7   :  { %1601 = vmatmul.msk.f32.gmra.mxu2 %vm856_vm2, %v823_v31 }
  0xca   :  { %306 = vrot.lane.b32.xlu1 %v99_v33, %s1696_s16  ;;  %634 = vrot.lane.b32.xlu0 %v199_v34, %s1697_s25  ;;  %v138_v33 = vld [vmem:[%s2838_s0 + $0x289] sm:$0xff]  ;;  %v68_v34 = vld [vmem:[%s2838_s0 + $0x240] sm:$0xff] }
  0xcb   :  { %330 = vrot.lane.b32.xlu2 %v111_v36, %s1696_s16 }
  0xcc   :  { %v551_v39 = vpop.permute.xlu1 %550  ;;  %v319_v40 = vpop.permute.xlu0 %318 }
  0xcd   :  { %v746_v41 = vsel %vm724_vm1, %v41_v37, %v319_v40  ;;  %v799_v42 = vsel %vm789_vm3, %v734_v38, %v551_v39  ;;  %v299_v44 = vpop.permute.xlu2 %298 }
  0xce   :  { %1577 = vmatmul.msk.f32.gmra.mxu0 %vm856_vm2, %v799_v42  ;;  %v811_v43 = vsel %vm789_vm3, %v746_v41, %v575_v11  ;;  %v189_v11 = vld [vmem:[%s2838_s0 + $0x1ea] sm:$0xff]  ;;  %v736_v16 = vsel %vm724_vm1, %v31_v13, %v299_v44  ;;  %v44_v44 = vld [vmem:[%s2838_s0 + $0x120] sm:$0xff] }
  0xcf   :  { %1589 = vmatmul.msk.f32.gmra.mxu1 %vm856_vm2, %v811_v43  ;;  %v178_v42 = vld [vmem:[%s2838_s0 + $0x16a] sm:$0xff] }
  0xd0   :  { %v114_v43 = vld [vmem:[%s2838_s0 + $0x169] sm:$0xff]  ;;  %v115_v13 = vld [vmem:[%s2838_s0 + $0x171] sm:$0xff] }
  0xd2   :  { %586 = vrot.lane.b32.xlu1 %v175_v45, %s1697_s25  ;;  %562 = vrot.lane.b32.xlu0 %v163_v46, %s1697_s25  ;;  %v32_v45 = vld [vmem:[%s2838_s0 + $0x90] sm:$0xff]  ;;  %v127_v46 = vld [vmem:[%s2838_s0 + $0x201] sm:$0xff] }
  0xd3   :  { %356 = vrot.lane.b32.xlu2 %v124_v47, %s1696_s16 }
  0xd4   :  { %v601_v49 = vpop.permute.xlu1 %600  ;;  %v345_v50 = vpop.permute.xlu0 %344 }
  0xd5   :  { %v759_v51 = vsel %vm724_vm1, %v54_v48, %v345_v50  ;;  %v579_v53 = vpop.permute.xlu2 %578 }
  0xd6   :  { %v824_v52 = vsel %vm789_vm3, %v759_v51, %v601_v49 }
  0xd7   :  { %1602 = vmatmul.msk.f32.gmra.mxu2 %vm856_vm2, %v824_v52 }
  0xda   :  { %612 = vrot.lane.b32.xlu1 %v188_v54, %s1697_s25  ;;  %380 = vrot.lane.b32.xlu0 %v136_v55, %s1696_s16 }
  0xdb   :  { %636 = vrot.lane.b32.xlu2 %v200_v57, %s1697_s25 }
  0xdc   :  { %v553_v60 = vpop.permute.xlu1 %552  ;;  %v321_v61 = vpop.permute.xlu0 %320 }
  0xdd   :  { %v747_v62 = vsel %vm724_vm1, %v42_v58, %v321_v61  ;;  %v800_v63 = vsel %vm789_vm3, %v735_v59, %v553_v60  ;;  %v605_v1 = vpop.permute.xlu2 %604  ;;  %v191_v59 = vld [vmem:[%s2838_s0 + $0x202] sm:$0xff]  ;;  %v139_v60 = vld [vmem:[%s2838_s0 + $0x291] sm:$0xff] }
  0xde   :  { %1578 = vmatmul.msk.f32.gmra.mxu0 %vm856_vm2, %v800_v63  ;;  %v812_v0 = vsel %vm789_vm3, %v747_v62, %v577_v32  ;;  %v190_v32 = vld [vmem:[%s2838_s0 + $0x1fa] sm:$0xff]  ;;  %v203_v62 = vld [vmem:[%s2838_s0 + $0x292] sm:$0xff]  ;;  %v69_v63 = vld [vmem:[%s2838_s0 + $0x248] sm:$0xff] }
  0xdf   :  { %1590 = vmatmul.msk.f32.gmra.mxu1 %vm856_vm2, %v812_v0  ;;  %v57_v61 = vld [vmem:[%s2838_s0 + $0x1b8] sm:$0xff] }
  0xe2   :  { %588 = vrot.lane.b32.xlu1 %v176_v2, %s1697_s25  ;;  %332 = vrot.lane.b32.xlu0 %v112_v3, %s1696_s16 }
  0xe3   :  { %358 = vrot.lane.b32.xlu2 %v125_v4, %s1696_s16 }
  0xe4   :  { %v603_v6 = vpop.permute.xlu1 %602  ;;  %v347_v7 = vpop.permute.xlu0 %346 }
  0xe5   :  { %v760_v8 = vsel %vm724_vm1, %v55_v5, %v347_v7  ;;  %v325_v10 = vpop.permute.xlu2 %324 }
  0xe6   :  { %v825_v9 = vsel %vm789_vm3, %v760_v8, %v603_v6  ;;  %v749_v48 = vsel %vm724_vm1, %v44_v44, %v325_v10 }
  0xe7   :  { %1603 = vmatmul.msk.f32.gmra.mxu2 %vm856_vm2, %v825_v9 }
  0xea   :  { %614 = vrot.lane.b32.xlu1 %v189_v11, %s1697_s25  ;;  %382 = vrot.lane.b32.xlu0 %v137_v12, %s1696_s16  ;;  %v179_v12 = vld [vmem:[%s2838_s0 + $0x172] sm:$0xff] }
  0xeb   :  { %638 = vrot.lane.b32.xlu2 %v201_v14, %s1697_s25  ;;  %v128_v14 = vld [vmem:[%s2838_s0 + $0x211] sm:$0xff] }
  0xec   :  { %v555_v17 = vpop.permute.xlu1 %554  ;;  %v323_v18 = vpop.permute.xlu0 %322 }
  0xed   :  { %v748_v19 = vsel %vm724_vm1, %v43_v15, %v323_v18  ;;  %v801_v20 = vsel %vm789_vm3, %v736_v16, %v555_v17  ;;  %v351_v22 = vpop.permute.xlu2 %350  ;;  %v33_v15 = vld [vmem:[%s2838_s0 + $0x98] sm:$0xff] }
  0xee   :  { %1579 = vmatmul.msk.f32.gmra.mxu0 %vm856_vm2, %v801_v20  ;;  %v813_v21 = vsel %vm789_vm3, %v748_v19, %v579_v53 }
  0xef   :  { %1591 = vmatmul.msk.f32.gmra.mxu1 %vm856_vm2, %v813_v21 }
  0xf2   :  { %590 = vrot.lane.b32.xlu1 %v177_v23, %s1697_s25  ;;  %334 = vrot.lane.b32.xlu0 %v113_v24, %s1696_s16 }
  0xf3   :  { %360 = vrot.lane.b32.xlu2 %v126_v25, %s1696_s16  ;;  %v192_v25 = vld [vmem:[%s2838_s0 + $0x212] sm:$0xff] }
  0xf4   :  { %v373_v27 = vpop.permute.xlu1 %372  ;;  %v349_v28 = vpop.permute.xlu0 %348 }
  0xf5   :  { %v761_v29 = vsel %vm724_vm1, %v56_v26, %v349_v28  ;;  %v631_v31 = vpop.permute.xlu2 %630  ;;  %v773_v37 = vsel %vm724_vm1, %v68_v34, %v373_v27  ;;  %v140_v26 = vld [vmem:[%s2838_s0 + $0x2a1] sm:$0xff] }
  0xf6   :  { %v826_v30 = vsel %vm789_vm3, %v761_v29, %v605_v1  ;;  %v762_v1 = vsel %vm724_vm1, %v57_v61, %v351_v22  ;;  %v45_v27 = vld [vmem:[%s2838_s0 + $0x128] sm:$0xff] }
  0xf7   :  { %1604 = vmatmul.msk.f32.gmra.mxu2 %vm856_vm2, %v826_v30  ;;  %v204_v28 = vld [vmem:[%s2838_s0 + $0x2a2] sm:$0xff] }
  0xfa   :  { %616 = vrot.lane.b32.xlu1 %v190_v32, %s1697_s25  ;;  %384 = vrot.lane.b32.xlu0 %v138_v33, %s1696_s16 }
  0xfb   :  { %v1070_v36 = vpop.f32.mrf.mxu0  ;;  %640 = vrot.lane.b32.xlu2 %v202_v35, %s1697_s25 }
  0xfc   :  { %1262 = vst [vmem:[#allocation2] sm:$0xff] %v1070_v36  ;;  %v301_v38 = vpop.permute.xlu1 %300  ;;  %v629_v39 = vpop.permute.xlu0 %628  ;;  %v1395_v47 = vmul.f32 %v1070_v36, %v1070_v36 }
  0xfd   :  { %v838_v40 = vsel %vm789_vm3, %v773_v37, %v629_v39  ;;  %v2277_v41 = vpop.permute.xlu2 %558  ;;  %v737_v50 = vsel %vm724_vm1, %v32_v45, %v301_v38  ;;  %v141_v39 = vld [vmem:[%s2838_s0 + $0x2a9] sm:$0xff] }
  0xfe   :  { %1616 = vmatmul.msk.f32.vlgmr.msra.gmra.mxu3 %vm856_vm2, %v838_v40  ;;  %v129_v40 = vld [vmem:[%s2838_s0 + $0x219] sm:$0xff] }
 0x102   :  { %592 = vrot.lane.b32.xlu1 %v178_v42, %s1697_s25  ;;  %336 = vrot.lane.b32.xlu0 %v114_v43, %s1696_s16  ;;  %v58_v42 = vld [vmem:[%s2838_s0 + $0x1c8] sm:$0xff]  ;;  %v193_v43 = vld [vmem:[%s2838_s0 + $0x21a] sm:$0xff] }
 0x103   :  { %v1073_v49 = vpop.f32.mrf.mxu0  ;;  %362 = vrot.lane.b32.xlu2 %v127_v46, %s1696_s16 }
 0x104   :  { %1263 = vst [vmem:[#allocation2 + $0x8] sm:$0xff] %v1073_v49  ;;  %v1326_v51 = vadd.f32 %v1073_v49, %v1070_v36  ;;  %v1396_v52 = vmul.f32 %v1073_v49, %v1073_v49  ;;  %v581_v53 = vpop.permute.xlu1 %580  ;;  %v557_v54 = vpop.permute.xlu0 %556 }
 0x105   :  { %v802_v55 = vsel %vm789_vm3, %v737_v50, %v557_v54  ;;  %v814_v56 = vsel %vm789_vm3, %v749_v48, %v581_v53  ;;  %v2303_v58 = vpop.permute.xlu2 %376 }
 0x106   :  { %v1459_v57 = vadd.f32 %v1396_v52, %v1395_v47  ;;  %1580 = vmatmul.msk.f32.gmra.mxu0 %vm856_vm2, %v802_v55  ;;  %1592 = vmatmul.msk.f32.gmra.mxu1 %vm856_vm2, %v814_v56  ;;  %v130_v56 = vld [vmem:[%s2838_s0 + $0x229] sm:$0xff] }
 0x10a   :  { %618 = vrot.lane.b32.xlu1 %v191_v59, %s1697_s25  ;;  %386 = vrot.lane.b32.xlu0 %v139_v60, %s1696_s16  ;;  %v142_v59 = vld [vmem:[%s2838_s0 + $0x2b9] sm:$0xff] }
 0x10b   :  { %v1076_v0 = vpop.f32.mrf.mxu0  ;;  %642 = vrot.lane.b32.xlu2 %v203_v62, %s1697_s25  ;;  %v46_v60 = vld [vmem:[%s2838_s0 + $0x138] sm:$0xff] }
 0x10c   :  { %1264 = vst [vmem:[#allocation2 + $0x10] sm:$0xff] %v1076_v0  ;;  %v1327_v2 = vadd.f32 %v1326_v51, %v1076_v0  ;;  %v1397_v3 = vmul.f32 %v1076_v0, %v1076_v0  ;;  %v607_v4 = vpop.permute.xlu1 %606  ;;  %v375_v5 = vpop.permute.xlu0 %374 }
 0x10d   :  { %v774_v6 = vsel %vm724_vm1, %v69_v63, %v375_v5  ;;  %v2325_v7 = vpop.f32.mrf.mxu1  ;;  %v827_v8 = vsel %vm789_vm3, %v762_v1, %v607_v4  ;;  %v2331_v11 = vpop.permute.xlu2 %304 }
 0x10e   :  { %v1460_v9 = vadd.f32 %v1459_v57, %v1397_v3  ;;  %1278 = vst [vmem:[#allocation2 + $0x80] sm:$0xff] %v2325_v7  ;;  %1605 = vmatmul.msk.f32.gmra.mxu2 %vm856_vm2, %v827_v8  ;;  %v839_v10 = vsel %vm789_vm3, %v774_v6, %v631_v31  ;;  %v205_v57 = vld [vmem:[%s2838_s0 + $0x2aa] sm:$0xff] }
 0x10f   :  { %1617 = vmatmul.msk.f32.gmra.mxu3 %vm856_vm2, %v839_v10  ;;  %v206_v10 = vld [vmem:[%s2838_s0 + $0x2ba] sm:$0xff] }
 0x112   :  { %594 = vrot.lane.b32.xlu1 %v179_v12, %s1697_s25  ;;  %338 = vrot.lane.b32.xlu0 %v115_v13, %s1696_s16  ;;  %v131_v12 = vld [vmem:[%s2838_s0 + $0x231] sm:$0xff] }
 0x113   :  { %v1079_v16 = vpop.f32.mrf.mxu0  ;;  %364 = vrot.lane.b32.xlu2 %v128_v14, %s1696_s16  ;;  %v59_v13 = vld [vmem:[%s2838_s0 + $0x1d0] sm:$0xff] }
 0x114   :  { %1265 = vst [vmem:[#allocation2 + $0x18] sm:$0xff] %v1079_v16  ;;  %v1328_v17 = vadd.f32 %v1327_v2, %v1079_v16  ;;  %v1398_v18 = vmul.f32 %v1079_v16, %v1079_v16  ;;  %v327_v19 = vpop.permute.xlu1 %326  ;;  %v303_v20 = vpop.permute.xlu0 %302 }
 0x115   :  { %v738_v21 = vsel %vm724_vm1, %v33_v15, %v303_v20  ;;  %v2352_v24 = vpop.permute.xlu2 %584  ;;  %v750_v31 = vsel %vm724_vm1, %v45_v27, %v327_v19 }
 0x116   :  { %v1461_v22 = vadd.f32 %v1460_v9, %v1398_v18  ;;  %v803_v23 = vsel %vm789_vm3, %v738_v21, %v2277_v41  ;;  %v70_v41 = vld [vmem:[%s2838_s0 + $0x258] sm:$0xff] }
 0x117   :  { %1581 = vmatmul.msk.f32.gmra.mxu0 %vm856_vm2, %v803_v23  ;;  %v775_v44 = vsel %vm724_vm1, %v70_v41, %v2303_v58  ;;  %v34_v58 = vld [vmem:[%s2838_s0 + $0xa8] sm:$0xff]  ;;  %v195_v23 = vld [vmem:[%s2838_s0 + $0x232] sm:$0xff] }
 0x118   :  { %v739_v62 = vsel %vm724_vm1, %v34_v58, %v2331_v11  ;;  %v194_v11 = vld [vmem:[%s2838_s0 + $0x22a] sm:$0xff] }
 0x119   :  { %v35_v41 = vld [vmem:[%s2838_s0 + $0xb0] sm:$0xff] }
 0x11a   :  { %620 = vrot.lane.b32.xlu1 %v192_v25, %s1697_s25  ;;  %388 = vrot.lane.b32.xlu0 %v140_v26, %s1696_s16  ;;  %v71_v25 = vld [vmem:[%s2838_s0 + $0x260] sm:$0xff]  ;;  %v210_v58 = vld [vmem:[%s2838_s0 + $0x2ea] sm:$0xff] }
 0x11b   :  { %v1082_v29 = vpop.f32.mrf.mxu0  ;;  %v2369_v30 = vpop.f32.mrf.mxu1  ;;  %644 = vrot.lane.b32.xlu2 %v204_v28, %s1697_s25  ;;  %v207_v26 = vld [vmem:[%s2838_s0 + $0x2c2] sm:$0xff] }
 0x11c   :  { %1266 = vst [vmem:[#allocation2 + $0x20] sm:$0xff] %v1082_v29  ;;  %v1329_v32 = vadd.f32 %v1328_v17, %v1082_v29  ;;  %v1399_v33 = vmul.f32 %v1082_v29, %v1082_v29  ;;  %v353_v34 = vpop.permute.xlu1 %352  ;;  %v583_v35 = vpop.permute.xlu0 %582 }
 0x11d   :  { %1279 = vst [vmem:[#allocation2 + $0x88] sm:$0xff] %v2369_v30  ;;  %v815_v36 = vsel %vm789_vm3, %v750_v31, %v583_v35  ;;  %v2376_v38 = vpop.permute.xlu2 %610  ;;  %v763_v47 = vsel %vm724_vm1, %v58_v42, %v353_v34  ;;  %v47_v42 = vld [vmem:[%s2838_s0 + $0x140] sm:$0xff] }
 0x11e   :  { %v1462_v37 = vadd.f32 %v1461_v22, %v1399_v33  ;;  %1593 = vmatmul.msk.f32.gmra.mxu1 %vm856_vm2, %v815_v36 }
 0x122   :  { %390 = vrot.lane.b32.xlu1 %v141_v39, %s1696_s16  ;;  %366 = vrot.lane.b32.xlu0 %v129_v40, %s1696_s16  ;;  %v144_v39 = vld [vmem:[%s2838_s0 + $0x2d1] sm:$0xff] }
 0x123   :  { %v1085_v45 = vpop.f32.mrf.mxu0  ;;  %v2397_v46 = vpop.f32.mrf.mxu1  ;;  %622 = vrot.lane.b32.xlu2 %v193_v43, %s1697_s25  ;;  %v208_v40 = vld [vmem:[%s2838_s0 + $0x2d2] sm:$0xff] }
 0x124   :  { %1267 = vst [vmem:[#allocation2 + $0x28] sm:$0xff] %v1085_v45  ;;  %v1330_v48 = vadd.f32 %v1329_v32, %v1085_v45  ;;  %v1400_v49 = vmul.f32 %v1085_v45, %v1085_v45  ;;  %v633_v50 = vpop.permute.xlu1 %632  ;;  %v609_v51 = vpop.permute.xlu0 %608  ;;  %v145_v43 = vld [vmem:[%s2838_s0 + $0x2d9] sm:$0xff] }
 0x125   :  { %1280 = vst [vmem:[#allocation2 + $0x90] sm:$0xff] %v2397_v46  ;;  %v828_v52 = vsel %vm789_vm3, %v763_v47, %v609_v51  ;;  %v840_v53 = vsel %vm789_vm3, %v775_v44, %v633_v50  ;;  %v2406_v55 = vpop.permute.xlu2 %330 }
 0x126   :  { %v1463_v54 = vadd.f32 %v1462_v37, %v1400_v49  ;;  %1606 = vmatmul.msk.f32.gmra.mxu2 %vm856_vm2, %v828_v52  ;;  %1618 = vmatmul.msk.f32.gmra.mxu3 %vm856_vm2, %v840_v53  ;;  %v752_v45 = vsel %vm724_vm1, %v47_v42, %v2406_v55  ;;  %v209_v52 = vld [vmem:[%s2838_s0 + $0x2da] sm:$0xff]  ;;  %v146_v53 = vld [vmem:[%s2838_s0 + $0x2e9] sm:$0xff] }
 0x12a   :  { %368 = vrot.lane.b32.xlu1 %v130_v56, %s1696_s16  ;;  %646 = vrot.lane.b32.xlu0 %v205_v57, %s1697_s25  ;;  %v72_v56 = vld [vmem:[%s2838_s0 + $0x270] sm:$0xff] }
 0x12b   :  { %v1088_v61 = vpop.f32.mrf.mxu0  ;;  %392 = vrot.lane.b32.xlu2 %v142_v59, %s1696_s16 }
 0x12c   :  { %1268 = vst [vmem:[#allocation2 + $0x30] sm:$0xff] %v1088_v61  ;;  %v1331_v63 = vadd.f32 %v1330_v48, %v1088_v61  ;;  %v1401_v0 = vmul.f32 %v1088_v61, %v1088_v61  ;;  %v561_v1 = vpop.permute.xlu1 %560  ;;  %v329_v2 = vpop.permute.xlu0 %328 }
 0x12d   :  { %v751_v3 = vsel %vm724_vm1, %v46_v60, %v329_v2  ;;  %v2429_v4 = vpop.f32.mrf.mxu1  ;;  %v804_v5 = vsel %vm789_vm3, %v739_v62, %v561_v1  ;;  %v2436_v9 = vpop.permute.xlu2 %356 }
 0x12e   :  { %v1464_v6 = vadd.f32 %v1463_v54, %v1401_v0  ;;  %1281 = vst [vmem:[#allocation2 + $0x98] sm:$0xff] %v2429_v4  ;;  %1582 = vmatmul.msk.f32.gmra.mxu0 %vm856_vm2, %v804_v5  ;;  %v816_v8 = vsel %vm789_vm3, %v751_v3, %v2352_v24  ;;  %v143_v24 = vld [vmem:[%s2838_s0 + $0x2c1] sm:$0xff] }
 0x12f   :  { %1594 = vmatmul.msk.f32.gmra.mxu1 %vm856_vm2, %v816_v8  ;;  %v60_v54 = vld [vmem:[%s2838_s0 + $0x1e0] sm:$0xff]  ;;  %v211_v8 = vld [vmem:[%s2838_s0 + $0x2f2] sm:$0xff] }
 0x130   :  { %v765_v59 = vsel %vm724_vm1, %v60_v54, %v2436_v9 }
 0x132   :  { %648 = vrot.lane.b32.xlu1 %v206_v10, %s1697_s25  ;;  %624 = vrot.lane.b32.xlu0 %v194_v11, %s1697_s25  ;;  %v48_v10 = vld [vmem:[%s2838_s0 + $0x150] sm:$0xff] }
 0x133   :  { %v1091_v14 = vpop.f32.mrf.mxu0  ;;  %370 = vrot.lane.b32.xlu2 %v131_v12, %s1696_s16 }
 0x134   :  { %1269 = vst [vmem:[#allocation2 + $0x38] sm:$0xff] %v1091_v14  ;;  %v1332_v15 = vadd.f32 %v1331_v63, %v1091_v14  ;;  %v1402_v16 = vmul.f32 %v1091_v14, %v1091_v14  ;;  %v379_v17 = vpop.permute.xlu1 %378  ;;  %v355_v18 = vpop.permute.xlu0 %354 }
 0x135   :  { %v764_v19 = vsel %vm724_vm1, %v59_v13, %v355_v18  ;;  %v2457_v22 = vpop.permute.xlu2 %636  ;;  %v776_v29 = vsel %vm724_vm1, %v71_v25, %v379_v17  ;;  %v73_v18 = vld [vmem:[%s2838_s0 + $0x278] sm:$0xff] }
 0x136   :  { %v1465_v20 = vadd.f32 %v1464_v6, %v1402_v16  ;;  %v829_v21 = vsel %vm789_vm3, %v764_v19, %v2376_v38  ;;  %v147_v6 = vld [vmem:[%s2838_s0 + $0x2f1] sm:$0xff] }
 0x137   :  { %1607 = vmatmul.msk.f32.gmra.mxu2 %vm856_vm2, %v829_v21 }
 0x13a   :  { %626 = vrot.lane.b32.xlu1 %v195_v23, %s1697_s25  ;;  %394 = vrot.lane.b32.xlu0 %v143_v24, %s1696_s16  ;;  %v2474_v27 = vpop.f32.mrf.mxu2 }
 0x13b   :  { %1294 = vst [vmem:[#allocation2 + $0x100] sm:$0xff] %v2474_v27  ;;  %v1094_v28 = vpop.f32.mrf.mxu0  ;;  %650 = vrot.lane.b32.xlu2 %v207_v26, %s1697_s25 }
 0x13c   :  { %1270 = vst [vmem:[#allocation2 + $0x40] sm:$0xff] %v1094_v28  ;;  %v1333_v31 = vadd.f32 %v1332_v15, %v1094_v28  ;;  %v1403_v32 = vmul.f32 %v1094_v28, %v1094_v28  ;;  %v307_v33 = vpop.permute.xlu1 %306  ;;  %v635_v34 = vpop.permute.xlu0 %634  ;;  %v61_v15 = vld [vmem:[%s2838_s0 + $0x1e8] sm:$0xff] }
 0x13d   :  { %v2479_v35 = vpop.f32.mrf.mxu1  ;;  %v841_v36 = vsel %vm789_vm3, %v776_v29, %v635_v34  ;;  %v359_v38 = vpop.permute.xlu2 %358  ;;  %v740_v44 = vsel %vm724_vm1, %v35_v41, %v307_v33  ;;  %v74_v41 = vld [vmem:[%s2838_s0 + $0x288] sm:$0xff] }
 0x13e   :  { %v1466_v37 = vadd.f32 %v1465_v20, %v1403_v32  ;;  %1282 = vst [vmem:[#allocation2 + $0xa0] sm:$0xff] %v2479_v35  ;;  %1619 = vmatmul.msk.f32.gmra.mxu3 %vm856_vm2, %v841_v36  ;;  %v766_v20 = vsel %vm724_vm1, %v61_v15, %v359_v38  ;;  %v49_v32 = vld [vmem:[%s2838_s0 + $0x158] sm:$0xff] }
 0x142   :  { %396 = vrot.lane.b32.xlu0 %v144_v39, %s1696_s16  ;;  %652 = vrot.lane.b32.xlu1 %v208_v40, %s1697_s25  ;;  %v62_v39 = vld [vmem:[%s2838_s0 + $0x1f8] sm:$0xff] }
 0x143   :  { %398 = vrot.lane.b32.xlu2 %v145_v43, %s1696_s16 }
 0x144   :  { %v587_v47 = vpop.permute.xlu1 %586  ;;  %v563_v48 = vpop.permute.xlu0 %562 }
 0x145   :  { %v805_v49 = vsel %vm789_vm3, %v740_v44, %v563_v48  ;;  %v817_v50 = vsel %vm789_vm3, %v752_v45, %v587_v47  ;;  %v639_v51 = vpop.permute.xlu2 %638 }
 0x146   :  { %1583 = vmatmul.msk.f32.gmra.mxu0 %vm856_vm2, %v805_v49  ;;  %1595 = vmatmul.msk.f32.gmra.mxu1 %vm856_vm2, %v817_v50 }
 0x14a   :  { %v2518_v55 = vpop.f32.mrf.mxu2  ;;  %654 = vrot.lane.b32.xlu0 %v209_v52, %s1697_s25  ;;  %400 = vrot.lane.b32.xlu1 %v146_v53, %s1696_s16 }
 0x14b   :  { %1295 = vst [vmem:[#allocation2 + $0x108] sm:$0xff] %v2518_v55  ;;  %v1097_v57 = vpop.f32.mrf.mxu0  ;;  %656 = vrot.lane.b32.xlu2 %v210_v58, %s1697_s25 }
 0x14c   :  { %1271 = vst [vmem:[#allocation2 + $0x48] sm:$0xff] %v1097_v57  ;;  %v1334_v60 = vadd.f32 %v1333_v31, %v1097_v57  ;;  %v1404_v61 = vmul.f32 %v1097_v57, %v1097_v57  ;;  %v613_v62 = vpop.permute.xlu1 %612  ;;  %v381_v63 = vpop.permute.xlu0 %380 }
 0x14d   :  { %v777_v0 = vsel %vm724_vm1, %v72_v56, %v381_v63  ;;  %v2533_v1 = vpop.f32.mrf.mxu1  ;;  %v830_v2 = vsel %vm789_vm3, %v765_v59, %v613_v62  ;;  %v361_v9 = vpop.permute.xlu2 %360  ;;  %v50_v56 = vld [vmem:[%s2838_s0 + $0x168] sm:$0xff]  ;;  %v63_v62 = vld [vmem:[%s2838_s0 + $0x200] sm:$0xff] }
 0x14e   :  { %v1467_v3 = vadd.f32 %v1466_v37, %v1404_v61  ;;  %1283 = vst [vmem:[#allocation2 + $0xa8] sm:$0xff] %v2533_v1  ;;  %1608 = vmatmul.msk.f32.gmra.mxu2 %vm856_vm2, %v830_v2  ;;  %v842_v5 = vsel %vm789_vm3, %v777_v0, %v2457_v22  ;;  %v767_v43 = vsel %vm724_vm1, %v62_v39, %v361_v9  ;;  %v75_v0 = vld [vmem:[%s2838_s0 + $0x290] sm:$0xff] }
 0x14f   :  { %1620 = vmatmul.msk.f32.gmra.mxu3 %vm856_vm2, %v842_v5 }
 0x152   :  { %402 = vrot.lane.b32.xlu0 %v147_v6, %s1696_s16  ;;  %658 = vrot.lane.b32.xlu1 %v211_v8, %s1697_s25 }
 0x154   :  { %v589_v11 = vpop.permute.xlu1 %588  ;;  %v333_v12 = vpop.permute.xlu0 %332 }
 0x155   :  { %v753_v13 = vsel %vm724_vm1, %v48_v10, %v333_v12  ;;  %v641_v16 = vpop.permute.xlu2 %640 }
 0x156   :  { %v818_v14 = vsel %vm789_vm3, %v753_v13, %v589_v11  ;;  %v51_v11 = vld [vmem:[%s2838_s0 + $0x170] sm:$0xff] }
 0x157   :  { %1596 = vmatmul.msk.f32.gmra.mxu1 %vm856_vm2, %v818_v14 }
 0x15a   :  { %v2558_v17 = vpop.f32.mrf.mxu2 }
 0x15b   :  { %1296 = vst [vmem:[#allocation2 + $0x110] sm:$0xff] %v2558_v17  ;;  %v1100_v19 = vpop.f32.mrf.mxu0 }
 0x15c   :  { %1272 = vst [vmem:[#allocation2 + $0x50] sm:$0xff] %v1100_v19  ;;  %v1335_v21 = vadd.f32 %v1334_v60, %v1100_v19  ;;  %v1405_v22 = vmul.f32 %v1100_v19, %v1100_v19  ;;  %v615_v23 = vpop.permute.xlu1 %614  ;;  %v383_v24 = vpop.permute.xlu0 %382 }
 0x15d   :  { %v778_v25 = vsel %vm724_vm1, %v73_v18, %v383_v24  ;;  %v2566_v26 = vpop.f32.mrf.mxu1  ;;  %v831_v28 = vsel %vm789_vm3, %v766_v20, %v615_v23  ;;  %v363_v33 = vpop.permute.xlu2 %362  ;;  %v64_v23 = vld [vmem:[%s2838_s0 + $0x210] sm:$0xff]  ;;  %v76_v24 = vld [vmem:[%s2838_s0 + $0x2a0] sm:$0xff] }
 0x15e   :  { %v1468_v29 = vadd.f32 %v1467_v3, %v1405_v22  ;;  %1284 = vst [vmem:[#allocation2 + $0xb0] sm:$0xff] %v2566_v26  ;;  %1609 = vmatmul.msk.f32.gmra.mxu2 %vm856_vm2, %v831_v28  ;;  %v843_v31 = vsel %vm789_vm3, %v778_v25, %v639_v51  ;;  %v768_v2 = vsel %vm724_vm1, %v63_v62, %v363_v33 }
 0x15f   :  { %1621 = vmatmul.msk.f32.gmra.mxu3 %vm856_vm2, %v843_v31 }
 0x164   :  { %v591_v34 = vpop.permute.xlu1 %590  ;;  %v335_v36 = vpop.permute.xlu0 %334 }
 0x165   :  { %v754_v37 = vsel %vm724_vm1, %v49_v32, %v335_v36  ;;  %v643_v54 = vpop.permute.xlu2 %642 }
 0x166   :  { %v819_v38 = vsel %vm789_vm3, %v754_v37, %v591_v34 }
 0x167   :  { %1597 = vmatmul.msk.f32.gmra.mxu1 %vm856_vm2, %v819_v38  ;;  %v65_v38 = vld [vmem:[%s2838_s0 + $0x218] sm:$0xff] }
 0x16a   :  { %v2582_v40 = vpop.f32.mrf.mxu2 }
 0x16b   :  { %1297 = vst [vmem:[#allocation2 + $0x118] sm:$0xff] %v2582_v40  ;;  %v1103_v42 = vpop.f32.mrf.mxu0 }
 0x16c   :  { %1273 = vst [vmem:[#allocation2 + $0x58] sm:$0xff] %v1103_v42  ;;  %v1336_v44 = vadd.f32 %v1335_v21, %v1103_v42  ;;  %v1406_v45 = vmul.f32 %v1103_v42, %v1103_v42  ;;  %v617_v47 = vpop.permute.xlu1 %616  ;;  %v385_v48 = vpop.permute.xlu0 %384 }
 0x16d   :  { %v779_v49 = vsel %vm724_vm1, %v74_v41, %v385_v48  ;;  %v2590_v50 = vpop.f32.mrf.mxu1  ;;  %v832_v51 = vsel %vm789_vm3, %v767_v43, %v617_v47  ;;  %v365_v61 = vpop.permute.xlu2 %364 }
 0x16e   :  { %v1469_v52 = vadd.f32 %v1468_v29, %v1406_v45  ;;  %1285 = vst [vmem:[#allocation2 + $0xb8] sm:$0xff] %v2590_v50  ;;  %1610 = vmatmul.msk.f32.gmra.mxu2 %vm856_vm2, %v832_v51  ;;  %v844_v53 = vsel %vm789_vm3, %v779_v49, %v641_v16  ;;  %v769_v25 = vsel %vm724_vm1, %v64_v23, %v365_v61  ;;  %v77_v51 = vld [vmem:[%s2838_s0 + $0x2a8] sm:$0xff] }
 0x16f   :  { %1622 = vmatmul.msk.f32.gmra.mxu3 %vm856_vm2, %v844_v53 }
 0x174   :  { %v593_v57 = vpop.permute.xlu1 %592  ;;  %v337_v58 = vpop.permute.xlu0 %336 }
 0x175   :  { %v755_v59 = vsel %vm724_vm1, %v50_v56, %v337_v58  ;;  %v645_v12 = vpop.permute.xlu2 %644  ;;  %v66_v58 = vld [vmem:[%s2838_s0 + $0x228] sm:$0xff] }
 0x176   :  { %v820_v60 = vsel %vm789_vm3, %v755_v59, %v593_v57  ;;  %v78_v59 = vld [vmem:[%s2838_s0 + $0x2b8] sm:$0xff] }
 0x177   :  { %1598 = vmatmul.msk.f32.gmra.mxu1 %vm856_vm2, %v820_v60 }
 0x17a   :  { %v2606_v63 = vpop.f32.mrf.mxu2 }
 0x17b   :  { %1298 = vst [vmem:[#allocation2 + $0x120] sm:$0xff] %v2606_v63 }
 0x17c   :  { %v619_v3 = vpop.permute.xlu1 %618  ;;  %v387_v5 = vpop.permute.xlu0 %386 }
 0x17d   :  { %v780_v6 = vsel %vm724_vm1, %v75_v0, %v387_v5  ;;  %v833_v8 = vsel %vm789_vm3, %v768_v2, %v619_v3  ;;  %v623_v33 = vpop.permute.xlu2 %622 }
 0x17e   :  { %1611 = vmatmul.msk.f32.gmra.mxu2 %vm856_vm2, %v833_v8  ;;  %v845_v9 = vsel %vm789_vm3, %v780_v6, %v643_v54  ;;  %v67_v6 = vld [vmem:[%s2838_s0 + $0x230] sm:$0xff] }
 0x17f   :  { %1623 = vmatmul.msk.f32.gmra.mxu3 %vm856_vm2, %v845_v9 }
 0x181   :  { %v2618_v10 = vpop.f32.mrf.mxu3 }
 0x182   :  { %1310 = vst [vmem:[#allocation2 + $0x180] sm:$0xff] %v2618_v10 }
 0x183   :  { %v1106_v13 = vpop.f32.mrf.mxu0  ;;  %v2624_v14 = vpop.f32.mrf.mxu1 }
 0x184   :  { %1274 = vst [vmem:[#allocation2 + $0x60] sm:$0xff] %v1106_v13  ;;  %v1337_v15 = vadd.f32 %v1336_v44, %v1106_v13  ;;  %v1407_v16 = vmul.f32 %v1106_v13, %v1106_v13  ;;  %v595_v18 = vpop.permute.xlu1 %594  ;;  %v339_v19 = vpop.permute.xlu0 %338 }
 0x185   :  { %1286 = vst [vmem:[#allocation2 + $0xc0] sm:$0xff] %v2624_v14  ;;  %v756_v20 = vsel %vm724_vm1, %v51_v11, %v339_v19  ;;  %v393_v48 = vpop.permute.xlu2 %392  ;;  %v79_v11 = vld [vmem:[%s2838_s0 + $0x2c0] sm:$0xff] }
 0x186   :  { %v1470_v21 = vadd.f32 %v1469_v52, %v1407_v16  ;;  %v821_v22 = vsel %vm789_vm3, %v756_v20, %v595_v18  ;;  %v783_v62 = vsel %vm724_vm1, %v78_v59, %v393_v48 }
 0x187   :  { %1599 = vmatmul.msk.f32.gmra.mxu1 %vm856_vm2, %v821_v22 }
 0x18c   :  { %v621_v28 = vpop.permute.xlu1 %620  ;;  %v389_v29 = vpop.permute.xlu0 %388 }
 0x18d   :  { %v781_v31 = vsel %vm724_vm1, %v76_v24, %v389_v29  ;;  %v834_v32 = vsel %vm789_vm3, %v769_v25, %v621_v28  ;;  %v371_v60 = vpop.permute.xlu2 %370  ;;  %v80_v28 = vld [vmem:[%s2838_s0 + $0x2d0] sm:$0xff] }
 0x18e   :  { %1612 = vmatmul.msk.f32.gmra.mxu2 %vm856_vm2, %v834_v32  ;;  %v846_v34 = vsel %vm789_vm3, %v781_v31, %v645_v12 }
 0x18f   :  { %1624 = vmatmul.msk.f32.gmra.mxu3 %vm856_vm2, %v846_v34 }
 0x191   :  { %v2642_v36 = vpop.f32.mrf.mxu2 }
 0x192   :  { %1299 = vst [vmem:[#allocation2 + $0x128] sm:$0xff] %v2642_v36  ;;  %v2645_v37 = vpop.f32.mrf.mxu3 }
 0x193   :  { %1311 = vst [vmem:[#allocation2 + $0x188] sm:$0xff] %v2645_v37 }
 0x194   :  { %v391_v39 = vpop.permute.xlu1 %390  ;;  %v367_v41 = vpop.permute.xlu0 %366 }
 0x195   :  { %v770_v42 = vsel %vm724_vm1, %v65_v38, %v367_v41  ;;  %v1109_v43 = vpop.f32.mrf.mxu0  ;;  %v782_v53 = vsel %vm724_vm1, %v77_v51, %v391_v39  ;;  %v651_v13 = vpop.permute.xlu2 %650  ;;  %v81_v38 = vld [vmem:[%s2838_s0 + $0x2d8] sm:$0xff] }
 0x196   :  { %1275 = vst [vmem:[#allocation2 + $0x68] sm:$0xff] %v1109_v43  ;;  %v1338_v44 = vadd.f32 %v1337_v15, %v1109_v43  ;;  %v1408_v45 = vmul.f32 %v1109_v43, %v1109_v43  ;;  %v835_v47 = vsel %vm789_vm3, %v770_v42, %v623_v33  ;;  %v772_v15 = vsel %vm724_vm1, %v67_v6, %v371_v60 }
 0x197   :  { %1613 = vmatmul.msk.f32.gmra.mxu2 %vm856_vm2, %v835_v47 }
 0x198   :  { %v1471_v49 = vadd.f32 %v1470_v21, %v1408_v45  ;;  %v82_v45 = vld [vmem:[%s2838_s0 + $0x2e8] sm:$0xff] }
 0x19b   :  { %v2657_v52 = vpop.f32.mrf.mxu1 }
 0x19c   :  { %1287 = vst [vmem:[#allocation2 + $0xc8] sm:$0xff] %v2657_v52  ;;  %v369_v54 = vpop.permute.xlu1 %368  ;;  %v647_v56 = vpop.permute.xlu0 %646 }
 0x19d   :  { %v847_v57 = vsel %vm789_vm3, %v782_v53, %v647_v56  ;;  %v771_v61 = vsel %vm724_vm1, %v66_v58, %v369_v54  ;;  %v399_v34 = vpop.permute.xlu2 %398  ;;  %v1411_v58 = vmul.f32 %v2325_v7, %v2325_v7 }
 0x19e   :  { %1625 = vmatmul.msk.f32.gmra.mxu3 %vm856_vm2, %v847_v57  ;;  %v786_v41 = vsel %vm724_vm1, %v81_v38, %v399_v34  ;;  %v1420_v38 = vmul.f32 %v2657_v52, %v2657_v52 }
 0x1a4   :  { %v649_v0 = vpop.permute.xlu1 %648  ;;  %v625_v2 = vpop.permute.xlu0 %624 }
 0x1a5   :  { %v836_v3 = vsel %vm789_vm3, %v771_v61, %v625_v2  ;;  %v848_v5 = vsel %vm789_vm3, %v783_v62, %v649_v0  ;;  %v83_v62 = vld [vmem:[%s2838_s0 + $0x2f0] sm:$0xff]  ;;  %v1412_v0 = vmul.f32 %v2369_v30, %v2369_v30 }
 0x1a6   :  { %1614 = vmatmul.msk.f32.gmra.mxu2 %vm856_vm2, %v836_v3  ;;  %1626 = vmatmul.msk.f32.gmra.mxu3 %vm856_vm2, %v848_v5 }
 0x1a9   :  { %v2678_v8 = vpop.f32.mrf.mxu2  ;;  %v2680_v9 = vpop.f32.mrf.mxu3 }
 0x1aa   :  { %1300 = vst [vmem:[#allocation2 + $0x130] sm:$0xff] %v2678_v8 }
 0x1ab   :  { %1312 = vst [vmem:[#allocation2 + $0x190] sm:$0xff] %v2680_v9  ;;  %v1112_v12 = vpop.f32.mrf.mxu0 }
 0x1ac   :  { %1276 = vst [vmem:[#allocation2 + $0x70] sm:$0xff] %v1112_v12  ;;  %v1339_v16 = vadd.f32 %v1338_v44, %v1112_v12  ;;  %v1409_v18 = vmul.f32 %v1112_v12, %v1112_v12  ;;  %v627_v19 = vpop.permute.xlu1 %626  ;;  %v395_v20 = vpop.permute.xlu0 %394 }
 0x1ad   :  { %v784_v21 = vsel %vm724_vm1, %v79_v11, %v395_v20  ;;  %v2689_v22 = vpop.f32.mrf.mxu1  ;;  %v837_v23 = vsel %vm789_vm3, %v772_v15, %v627_v19 }
 0x1ae   :  { %v1472_v24 = vadd.f32 %v1471_v49, %v1409_v18  ;;  %1288 = vst [vmem:[#allocation2 + $0xd0] sm:$0xff] %v2689_v22  ;;  %1615 = vmatmul.msk.f32.gmra.mxu2 %vm856_vm2, %v837_v23  ;;  %v849_v25 = vsel %vm789_vm3, %v784_v21, %v651_v13  ;;  %v657_v49 = vpop.permute.xlu2 %656  ;;  %v1414_v13 = vmul.f32 %v2429_v4, %v2429_v4 }
 0x1af   :  { %1627 = vmatmul.msk.f32.gmra.mxu3 %vm856_vm2, %v849_v25 }
 0x1b4   :  { %v397_v29 = vpop.permute.xlu0 %396  ;;  %v653_v31 = vpop.permute.xlu1 %652 }
 0x1b5   :  { %v785_v32 = vsel %vm724_vm1, %v80_v28, %v397_v29  ;;  %v1418_v29 = vmul.f32 %v2590_v50, %v2590_v50 }
 0x1b6   :  { %v850_v33 = vsel %vm789_vm3, %v785_v32, %v653_v31 }
 0x1b7   :  { %1628 = vmatmul.msk.f32.gmra.mxu3 %vm856_vm2, %v850_v33  ;;  %v1419_v33 = vmul.f32 %v2624_v14, %v2624_v14 }
 0x1ba   :  { %v2705_v39 = vpop.f32.mrf.mxu2 }
 0x1bb   :  { %1301 = vst [vmem:[#allocation2 + $0x138] sm:$0xff] %v2705_v39 }
 0x1bc   :  { %v655_v42 = vpop.permute.xlu0 %654  ;;  %v401_v44 = vpop.permute.xlu1 %400 }
 0x1bd   :  { %v851_v43 = vsel %vm789_vm3, %v786_v41, %v655_v42  ;;  %v787_v48 = vsel %vm724_vm1, %v82_v45, %v401_v44 }
 0x1be   :  { %v852_v57 = vsel %vm789_vm3, %v787_v48, %v657_v49 }
 0x1bf   :  { %1629 = vmatmul.msk.f32.gmra.mxu3 %vm856_vm2, %v851_v43  ;;  %v1421_v43 = vmul.f32 %v2689_v22, %v2689_v22 }
 0x1c1   :  { %v2714_v47 = vpop.f32.mrf.mxu3 }
 0x1c2   :  { %1313 = vst [vmem:[#allocation2 + $0x198] sm:$0xff] %v2714_v47 }
 0x1c3   :  { %v1115_v51 = vpop.f32.mrf.mxu0  ;;  %v1151_v53 = vpop.f32.mrf.mxu1 }
 0x1c4   :  { %1277 = vst [vmem:[#allocation2 + $0x78] sm:$0xff] %v1115_v51  ;;  %v1340_v54 = vadd.f32 %v1339_v16, %v1115_v51  ;;  %v1410_v56 = vmul.f32 %v1115_v51, %v1115_v51  ;;  %v403_v61 = vpop.permute.xlu0 %402  ;;  %v659_v6 = vpop.permute.xlu1 %658  ;;  %v1422_v48 = vmul.f32 %v1151_v53, %v1151_v53 }
 0x1c5   :  { %1289 = vst [vmem:[#allocation2 + $0xd8] sm:$0xff] %v1151_v53  ;;  %v788_v5 = vsel %vm724_vm1, %v83_v62, %v403_v61 }
 0x1c6   :  { %v1341_v59 = vadd.f32 %v1340_v54, %v2325_v7  ;;  %v1473_v60 = vadd.f32 %v1472_v24, %v1410_v56  ;;  %v1413_v7 = vmul.f32 %v2397_v46, %v2397_v46  ;;  %v853_v18 = vsel %vm789_vm3, %v788_v5, %v659_v6 }
 0x1c7   :  { %1630 = vmatmul.msk.f32.gmra.mxu3 %vm856_vm2, %v852_v57 }
 0x1c8   :  { %v1342_v2 = vadd.f32 %v1341_v59, %v2369_v30  ;;  %v1474_v3 = vadd.f32 %v1473_v60, %v1411_v58  ;;  %v1415_v30 = vmul.f32 %v2479_v35, %v2479_v35 }
 0x1ca   :  { %v1343_v11 = vadd.f32 %v1342_v2, %v2397_v46  ;;  %v1475_v12 = vadd.f32 %v1474_v3, %v1412_v0  ;;  %v1416_v46 = vmul.f32 %v2533_v1, %v2533_v1 }
 0x1cc   :  { %v1344_v15 = vadd.f32 %v1343_v11, %v2429_v4  ;;  %v1476_v16 = vadd.f32 %v1475_v12, %v1413_v7  ;;  %v1417_v4 = vmul.f32 %v2566_v26, %v2566_v26 }
 0x1ce   :  { %v1345_v19 = vadd.f32 %v1344_v15, %v2479_v35  ;;  %v1477_v20 = vadd.f32 %v1476_v16, %v1414_v13  ;;  %v1427_v13 = vmul.f32 %v2474_v27, %v2474_v27 }
 0x1cf   :  { %1631 = vmatmul.msk.f32.gmra.mxu3 %vm856_vm2, %v853_v18  ;;  %v1428_v18 = vmul.f32 %v2518_v55, %v2518_v55 }
 0x1d0   :  { %v1346_v21 = vadd.f32 %v1345_v19, %v2533_v1  ;;  %v1478_v23 = vadd.f32 %v1477_v20, %v1415_v30  ;;  %v1429_v20 = vmul.f32 %v2558_v17, %v2558_v17 }
 0x1d1   :  { %v2744_v24 = vpop.f32.mrf.mxu2 }
 0x1d2   :  { %v1479_v25 = vadd.f32 %v1478_v23, %v1416_v46  ;;  %v1347_v28 = vadd.f32 %v1346_v21, %v2566_v26  ;;  %1302 = vst [vmem:[#allocation2 + $0x140] sm:$0xff] %v2744_v24  ;;  %v2750_v35 = vpop.f32.mrf.mxu3  ;;  %v1430_v23 = vmul.f32 %v2582_v40, %v2582_v40 }
 0x1d3   :  { %1314 = vst [vmem:[#allocation2 + $0x1a0] sm:$0xff] %v2750_v35 }
 0x1d4   :  { %v1348_v1 = vadd.f32 %v1347_v28, %v2590_v50  ;;  %v1480_v31 = vadd.f32 %v1479_v25, %v1417_v4  ;;  %v1154_v32 = vpop.f32.mrf.mxu1 }
 0x1d5   :  { %1290 = vst [vmem:[#allocation2 + $0xe0] sm:$0xff] %v1154_v32 }
 0x1d6   :  { %v1349_v34 = vadd.f32 %v1348_v1, %v2624_v14  ;;  %v1481_v26 = vadd.f32 %v1480_v31, %v1418_v29 }
 0x1d8   :  { %v1350_v41 = vadd.f32 %v1349_v34, %v2657_v52  ;;  %v1482_v42 = vadd.f32 %v1481_v26, %v1419_v33 }
 0x1da   :  { %v1351_v50 = vadd.f32 %v1350_v41, %v2689_v22  ;;  %v1483_v44 = vadd.f32 %v1482_v42, %v1420_v38 }
 0x1dc   :  { %v1352_v45 = vadd.f32 %v1351_v50, %v1151_v53  ;;  %v1484_v49 = vadd.f32 %v1483_v44, %v1421_v43  ;;  %v1423_v53 = vmul.f32 %v1154_v32, %v1154_v32 }
 0x1de   :  { %v1485_v51 = vadd.f32 %v1484_v49, %v1422_v48  ;;  %v1353_v58 = vadd.f32 %v1352_v45, %v1154_v32 }
 0x1e0   :  { %v1486_v60 = vadd.f32 %v1485_v51, %v1423_v53 }
 0x1e1   :  { %v1193_v54 = vpop.f32.mrf.mxu2 }
 0x1e2   :  { %1303 = vst [vmem:[#allocation2 + $0x148] sm:$0xff] %v1193_v54  ;;  %v2765_v14 = vpop.f32.mrf.mxu3  ;;  %v1436_v43 = vmul.f32 %v1193_v54, %v1193_v54 }
 0x1e3   :  { %1315 = vst [vmem:[#allocation2 + $0x1a8] sm:$0xff] %v2765_v14 }
 0x1e4   :  { %v1157_v56 = vpop.f32.mrf.mxu1 }
 0x1e5   :  { %1291 = vst [vmem:[#allocation2 + $0xe8] sm:$0xff] %v1157_v56  ;;  %v1424_v59 = vmul.f32 %v1157_v56, %v1157_v56  ;;  %v1354_v61 = vadd.f32 %v1353_v58, %v1157_v56 }
 0x1e7   :  { %v1487_v3 = vadd.f32 %v1486_v60, %v1424_v59 }
 0x1f1   :  { %v1196_v52 = vpop.f32.mrf.mxu2 }
 0x1f2   :  { %1304 = vst [vmem:[#allocation2 + $0x150] sm:$0xff] %v1196_v52  ;;  %v2768_v57 = vpop.f32.mrf.mxu3  ;;  %v1437_v49 = vmul.f32 %v1196_v52, %v1196_v52 }
 0x1f3   :  { %1316 = vst [vmem:[#allocation2 + $0x1b0] sm:$0xff] %v2768_v57 }
 0x1f4   :  { %v1160_v22 = vpop.f32.mrf.mxu1 }
 0x1f5   :  { %1292 = vst [vmem:[#allocation2 + $0xf0] sm:$0xff] %v1160_v22  ;;  %v1425_v62 = vmul.f32 %v1160_v22, %v1160_v22  ;;  %v1355_v5 = vadd.f32 %v1354_v61, %v1160_v22 }
 0x1f7   :  { %v1488_v7 = vadd.f32 %v1487_v3, %v1425_v62 }
 0x201   :  { %v1199_v0 = vpop.f32.mrf.mxu2 }
 0x202   :  { %1305 = vst [vmem:[#allocation2 + $0x158] sm:$0xff] %v1199_v0  ;;  %v2771_v2 = vpop.f32.mrf.mxu3  ;;  %v1438_v22 = vmul.f32 %v1199_v0, %v1199_v0 }
 0x203   :  { %1317 = vst [vmem:[#allocation2 + $0x1b8] sm:$0xff] %v2771_v2 }
 0x204   :  { %v1163_v6 = vpop.f32.mrf.mxu1 }
 0x205   :  { %1293 = vst [vmem:[#allocation2 + $0xf8] sm:$0xff] %v1163_v6  ;;  %v1356_v11 = vadd.f32 %v1355_v5, %v1163_v6  ;;  %v1426_v12 = vmul.f32 %v1163_v6, %v1163_v6 }
 0x207   :  { %v1357_v15 = vadd.f32 %v1356_v11, %v2474_v27  ;;  %v1489_v16 = vadd.f32 %v1488_v7, %v1426_v12  ;;  %v1431_v27 = vmul.f32 %v2606_v63, %v2606_v63 }
 0x209   :  { %v1358_v30 = vadd.f32 %v1357_v15, %v2518_v55  ;;  %v1490_v19 = vadd.f32 %v1489_v16, %v1427_v13  ;;  %v1432_v55 = vmul.f32 %v2642_v36, %v2642_v36 }
 0x20b   :  { %v1359_v46 = vadd.f32 %v1358_v30, %v2558_v17  ;;  %v1491_v21 = vadd.f32 %v1490_v19, %v1428_v18  ;;  %v1444_v18 = vmul.f32 %v2645_v37, %v2645_v37 }
 0x20d   :  { %v1360_v4 = vadd.f32 %v1359_v46, %v2582_v40  ;;  %v1492_v25 = vadd.f32 %v1491_v21, %v1429_v20  ;;  %v1433_v40 = vmul.f32 %v2678_v8, %v2678_v8  ;;  %v1445_v20 = vmul.f32 %v2680_v9, %v2680_v9 }
 0x20f   :  { %v1361_v28 = vadd.f32 %v1360_v4, %v2606_v63  ;;  %v1493_v29 = vadd.f32 %v1492_v25, %v1430_v23  ;;  %v1434_v63 = vmul.f32 %v2705_v39, %v2705_v39  ;;  %v1446_v23 = vmul.f32 %v2714_v47, %v2714_v47 }
 0x211   :  { %v1362_v1 = vadd.f32 %v1361_v28, %v2642_v36  ;;  %v1494_v31 = vadd.f32 %v1493_v29, %v1431_v27  ;;  %v1202_v17 = vpop.f32.mrf.mxu2  ;;  %v1435_v36 = vmul.f32 %v2744_v24, %v2744_v24  ;;  %v1447_v27 = vmul.f32 %v2750_v35, %v2750_v35 }
 0x212   :  { %1306 = vst [vmem:[#allocation2 + $0x160] sm:$0xff] %v1202_v17  ;;  %v2792_v32 = vpop.f32.mrf.mxu3  ;;  %v1439_v61 = vmul.f32 %v1202_v17, %v1202_v17  ;;  %v1698_v29 = vmov 0.0  }
 0x213   :  { %v1495_v33 = vadd.f32 %v1494_v31, %v1432_v55  ;;  %v1363_v34 = vadd.f32 %v1362_v1, %v2678_v8  ;;  %1318 = vst [vmem:[#allocation2 + $0x1c0] sm:$0xff] %v2792_v32 }
 0x214   :  { %19 = vst [vmem:[#allocation4] sm:$0x3] %v1698_v29 }
 0x215   :  { %v1364_v26 = vadd.f32 %v1363_v34, %v2705_v39  ;;  %v1496_v38 = vadd.f32 %v1495_v33, %v1433_v40  ;;  %v1450_v40 = vmul.f32 %v2771_v2, %v2771_v2 }
 0x217   :  { %v1365_v41 = vadd.f32 %v1364_v26, %v2744_v24  ;;  %v1497_v42 = vadd.f32 %v1496_v38, %v1434_v63  ;;  %v1451_v63 = vmul.f32 %v2792_v32, %v2792_v32 }
 0x219   :  { %v1366_v50 = vadd.f32 %v1365_v41, %v1193_v54  ;;  %v1498_v44 = vadd.f32 %v1497_v42, %v1435_v36 }
 0x21a   :  { %v1205_v45 = vpop.f32.mrf.mxu2 }
 0x21b   :  { %v1499_v48 = vadd.f32 %v1498_v44, %v1436_v43  ;;  %1307 = vst [vmem:[#allocation2 + $0x168] sm:$0xff] %v1205_v45  ;;  %v1367_v51 = vadd.f32 %v1366_v50, %v1196_v52  ;;  %v1440_v62 = vmul.f32 %v1205_v45, %v1205_v45 }
 0x21d   :  { %v1500_v56 = vadd.f32 %v1499_v48, %v1437_v49  ;;  %v1368_v39 = vadd.f32 %v1367_v51, %v1199_v0  ;;  %v1443_v0 = vmul.f32 %v2618_v10, %v2618_v10 }
 0x21f   :  { %v1501_v58 = vadd.f32 %v1500_v56, %v1438_v22  ;;  %v1369_v60 = vadd.f32 %v1368_v39, %v1202_v17 }
 0x221   :  { %v1241_v8 = vpop.f32.mrf.mxu3  ;;  %v1502_v24 = vadd.f32 %v1501_v58, %v1439_v61  ;;  %v1370_v54 = vadd.f32 %v1369_v60, %v1205_v45 }
 0x222   :  { %1319 = vst [vmem:[#allocation2 + $0x1c8] sm:$0xff] %v1241_v8  ;;  %v1452_v38 = vmul.f32 %v1241_v8, %v1241_v8 }
 0x223   :  { %v1503_v5 = vadd.f32 %v1502_v24, %v1440_v62 }
 0x229   :  { %v1208_v53 = vpop.f32.mrf.mxu2  ;;  %v1244_v59 = vpop.f32.mrf.mxu3 }
 0x22a   :  { %1308 = vst [vmem:[#allocation2 + $0x170] sm:$0xff] %v1208_v53  ;;  %v1441_v3 = vmul.f32 %v1208_v53, %v1208_v53  ;;  %v1371_v6 = vadd.f32 %v1370_v54, %v1208_v53  ;;  %v1453_v42 = vmul.f32 %v1244_v59, %v1244_v59 }
 0x22b   :  { %1320 = vst [vmem:[#allocation2 + $0x1d0] sm:$0xff] %v1244_v59 }
 0x22c   :  { %v1504_v11 = vadd.f32 %v1503_v5, %v1441_v3 }
 0x231   :  { %v1211_v7 = vpop.f32.mrf.mxu2 }
 0x232   :  { %1309 = vst [vmem:[#allocation2 + $0x178] sm:$0xff] %v1211_v7  ;;  %v1372_v52 = vadd.f32 %v1371_v6, %v1211_v7  ;;  %v1442_v12 = vmul.f32 %v1211_v7, %v1211_v7  ;;  %v1247_v13 = vpop.f32.mrf.mxu3 }
 0x233   :  { %1321 = vst [vmem:[#allocation2 + $0x1d8] sm:$0xff] %v1247_v13  ;;  %v1454_v44 = vmul.f32 %v1247_v13, %v1247_v13 }
 0x234   :  { %v1373_v15 = vadd.f32 %v1372_v52, %v2618_v10  ;;  %v1505_v16 = vadd.f32 %v1504_v11, %v1442_v12 }
 0x236   :  { %v1374_v30 = vadd.f32 %v1373_v15, %v2645_v37  ;;  %v1506_v19 = vadd.f32 %v1505_v16, %v1443_v0  ;;  %v1528_v16 = vld [vmem:[#allocation4] sm:$0x3] }
 0x238   :  { %v1375_v46 = vadd.f32 %v1374_v30, %v2680_v9  ;;  %v1507_v21 = vadd.f32 %v1506_v19, %v1444_v18  ;;  %v1448_v9 = vmul.f32 %v2765_v14, %v2765_v14 }
 0x23a   :  { %v1376_v4 = vadd.f32 %v1375_v46, %v2714_v47  ;;  %v1508_v25 = vadd.f32 %v1507_v21, %v1445_v20  ;;  %v1250_v10 = vpop.f32.mrf.mxu3  ;;  %v1449_v47 = vmul.f32 %v2768_v57, %v2768_v57 }
 0x23b   :  { %1322 = vst [vmem:[#allocation2 + $0x1e0] sm:$0xff] %v1250_v10  ;;  %v1455_v51 = vmul.f32 %v1250_v10, %v1250_v10 }
 0x23c   :  { %v1377_v37 = vadd.f32 %v1376_v4, %v2750_v35  ;;  %v1509_v28 = vadd.f32 %v1508_v25, %v1446_v23 }
 0x23e   :  { %v1378_v55 = vadd.f32 %v1377_v37, %v2765_v14  ;;  %v1510_v1 = vadd.f32 %v1509_v28, %v1447_v27 }
 0x240   :  { %v1511_v31 = vadd.f32 %v1510_v1, %v1448_v9  ;;  %v1379_v17 = vadd.f32 %v1378_v55, %v2768_v57 }
 0x242   :  { %v1380_v35 = vadd.f32 %v1379_v17, %v2771_v2  ;;  %v1512_v33 = vadd.f32 %v1511_v31, %v1449_v47  ;;  %v1253_v34 = vpop.f32.mrf.mxu3 }
 0x243   :  { %1323 = vst [vmem:[#allocation2 + $0x1e8] sm:$0xff] %v1253_v34  ;;  %v1456_v22 = vmul.f32 %v1253_v34, %v1253_v34 }
 0x244   :  { %v1381_v14 = vadd.f32 %v1380_v35, %v2792_v32  ;;  %v1513_v26 = vadd.f32 %v1512_v33, %v1450_v40 }
 0x246   :  { %v1382_v36 = vadd.f32 %v1381_v14, %v1241_v8  ;;  %v1514_v41 = vadd.f32 %v1513_v26, %v1451_v63 }
 0x248   :  { %v1383_v43 = vadd.f32 %v1382_v36, %v1244_v59  ;;  %v1515_v57 = vadd.f32 %v1514_v41, %v1452_v38 }
 0x24a   :  { %v1384_v50 = vadd.f32 %v1383_v43, %v1247_v13  ;;  %v1516_v45 = vadd.f32 %v1515_v57, %v1453_v42  ;;  %v1256_v48 = vpop.f32.mrf.mxu3 }
 0x24b   :  { %1324 = vst [vmem:[#allocation2 + $0x1f0] sm:$0xff] %v1256_v48  ;;  %v1457_v58 = vmul.f32 %v1256_v48, %v1256_v48 }
 0x24c   :  { %v1517_v2 = vadd.f32 %v1516_v45, %v1454_v44  ;;  %v1385_v49 = vadd.f32 %v1384_v50, %v1250_v10 }
 0x24e   :  { %v1518_v32 = vadd.f32 %v1517_v2, %v1455_v51  ;;  %v1386_v56 = vadd.f32 %v1385_v49, %v1253_v34 }
 0x250   :  { %v1519_v8 = vadd.f32 %v1518_v32, %v1456_v22  ;;  %v1387_v39 = vadd.f32 %v1386_v56, %v1256_v48 }
 0x252   :  { %v1520_v53 = vadd.f32 %v1519_v8, %v1457_v58  ;;  %v1259_v59 = vpop.f32.mrf.mxu3 }
 0x253   :  { %1325 = vst [vmem:[#allocation2 + $0x1f8] sm:$0xff] %v1259_v59  ;;  %v1388_v60 = vadd.f32 %v1387_v39, %v1259_v59  ;;  %v1458_v61 = vmul.f32 %v1259_v59, %v1259_v59 }
 0x254   :  { %1545 = dma.vmem_to_hbm [thread:$0]  %s1538_s14, 8192, %s1540_s12, [#allocation3], %s1700_s15, %s1700_s15, %s1697_s25  }
 0x255   :  { %v1389_v24 = vrot.slane %v1388_v60, 4  ;;  %v1521_v54 = vadd.f32 %v1520_v53, %v1458_v61  ;;  %s1553_s25 = sshll.u32 %s2841_s3, 4  ;;  %s1554_s25 = int_to_ptr.hbm [resolvable:$true] %s1553_s25 }
 0x257   :  { %v1390_v62 = vadd.f32 %v1389_v24, %v1388_v60  ;;  %v1522_v3 = vrot.slane %v1521_v54, 4 }
 0x259   :  { %v1391_v5 = vrot.slane %v1390_v62, 2  ;;  %v1523_v6 = vadd.f32 %v1522_v3, %v1521_v54 }
 0x25b   :  { %v1392_v7 = vadd.f32 %v1391_v5, %v1390_v62  ;;  %v1524_v11 = vrot.slane %v1523_v6, 2 }
 0x25d   :  { %v1393_v52 = vrot.slane %v1392_v7, 1  ;;  %v1525_v12 = vadd.f32 %v1524_v11, %v1523_v6 }
 0x25f   :  { %v1526_v13 = vrot.slane %v1525_v12, 1  ;;  %v1394_v0 = vadd.f32 %v1393_v52, %v1392_v7 }
 0x261   :  { %v1527_v15 = vadd.f32 %v1526_v13, %v1525_v12 }
 0x263   :  { %v1530_v18 = vsel %vm1529_vm4, %v1394_v0, %v1527_v15 }
 0x264   :  { %v1531_v30 = vadd.f32 %v1530_v18, %v1528_v16 }
 0x266   :  { %1532 = vst [vmem:[#allocation4] sm:$0x3] %v1531_v30 }
 0x267   :  { %1556 = dma.vmem_to_hbm [thread:$0]  %s1552_s17, 32, %s1554_s25, [#allocation5]  }
 0x268   :  { %1692 = dma.done.wait [#allocation3], 8192  }
 0x269   :  { %1693 = vsyncadd [#allocation3], 4294959104 }
 0x26a   :  { %1694 = dma.done.wait [#allocation5], 32  }
 0x26b   :  { %1695 = vsyncadd [#allocation5], 4294967264 }
 0x26c   :  { %1565 = vsyncpa [#allocation3], 1 }
 0x26d   :  { %1566 = vsyncpa [#allocation5], 1 }

</bundles_post_ra>
